<compile_context>
chip_gen: v6e
topology: v6e:2x2x1
jax: 0.10.0
libtpu: 0.0.40
codegen_flags: <defaults>
</compile_context>

<pallas_src>
import functools
import math

import jax
import jax.numpy as jnp
from jax.experimental import pallas as pl
from jax.experimental.pallas import tpu as pltpu

_LANE = 128   # lane (last-dim) alignment
_SUB = 8      # f32 sublane (second-to-last dim) alignment


def _round_up(n, m):
    return -(-n // m) * m


def _pad2(a, r, c, dtype=jnp.float32):
    a = a.astype(dtype)
    return jnp.pad(a, ((0, r - a.shape[0]), (0, c - a.shape[1])))


def _pad_rows_by_blocks(w, blocks):
    """Scatter weight rows into the lane-aligned slab layout of its input."""
    parts, off = [], 0
    for b in blocks:
        blk = w[off:off + b]
        parts.append(jnp.pad(blk, ((0, _round_up(b, _LANE) - b), (0, 0))))
        off += b
    return jnp.concatenate(parts, axis=0)


def _bf16(x):
    return x.astype(jnp.bfloat16)


# ---------------------------- Pallas kernels ----------------------------
# All matmuls: bf16 operands, f32 accumulation (preferred_element_type).
# Padded rows (n..npad) pick up bias+ReLU garbage; they are zeroed downstream
# by the zero-padded assign matrices or sliced off before use.

def _gcn_concat_score_kernel(a_ref, x_ref, w_ref, b_ref, wuv_ref, xcat_ref, uv_ref):
    # h = relu(A_hat @ (X @ W) + b); xcat = [X | h]; uv = xcat @ Wuv (pool scores)
    win = x_ref.shape[1]
    x = x_ref[...]
    xw = jnp.dot(_bf16(x), w_ref[...], preferred_element_type=jnp.float32)
    h = jnp.dot(_bf16(a_ref[...]), _bf16(xw), preferred_element_type=jnp.float32) + b_ref[...]
    h = jnp.maximum(h, 0.0)
    xcat_ref[:, :win] = x
    xcat_ref[:, win:] = h
    uv_ref[...] = (
        jnp.dot(_bf16(x), wuv_ref[:win, :], preferred_element_type=jnp.float32)
        + jnp.dot(_bf16(h), wuv_ref[win:, :], preferred_element_type=jnp.float32))


def _pool_gcn_concat_score_kernel(assign_ref, a_ref, x_ref, w_ref, b_ref, wuv_ref,
                                  xcat_ref, uv_ref):
    # xp = assign @ X (cluster sum-pool); h = relu(A_hat @ (xp @ W) + b);
    # xcat = [xp | h]; uv = xcat @ Wuv (next pooling layer's edge scores)
    win = x_ref.shape[1]
    xp = jnp.dot(_bf16(assign_ref[...]), _bf16(x_ref[...]),
                 preferred_element_type=jnp.float32)
    xw = jnp.dot(_bf16(xp), w_ref[...], preferred_element_type=jnp.float32)
    h = jnp.dot(_bf16(a_ref[...]), _bf16(xw), preferred_element_type=jnp.float32) + b_ref[...]
    h = jnp.maximum(h, 0.0)
    xcat_ref[:, :win] = xp
    xcat_ref[:, win:] = h
    uv_ref[...] = (
        jnp.dot(_bf16(xp), wuv_ref[:win, :], preferred_element_type=jnp.float32)
        + jnp.dot(_bf16(h), wuv_ref[win:, :], preferred_element_type=jnp.float32))


def _pool_gcn_kernel(assign_ref, a_ref, x_ref, w_ref, b_ref, h_ref):
    # xp = assign @ X; h = relu(A_hat @ (xp @ W) + b)
    xp = jnp.dot(_bf16(assign_ref[...]), _bf16(x_ref[...]),
                 preferred_element_type=jnp.float32)
    xw = jnp.dot(_bf16(xp), w_ref[...], preferred_element_type=jnp.float32)
    h = jnp.dot(_bf16(a_ref[...]), _bf16(xw), preferred_element_type=jnp.float32) + b_ref[...]
    h_ref[...] = jnp.maximum(h, 0.0)


def _tail_kernel(a_ref, xin_ref, h_ref, w7_ref, b7_ref, wf1_ref, bf1_ref,
                 wf2_ref, bf2_ref, o_ref):
    # conv7(relu) on [x_in | h], fc1(relu) on [x_in | h7], fc2 on [x_in | h_fc1].
    win = xin_ref.shape[1]
    xin_b = _bf16(xin_ref[...])
    xw = (jnp.dot(xin_b, w7_ref[:win, :], preferred_element_type=jnp.float32)
          + jnp.dot(_bf16(h_ref[...]), w7_ref[win:, :], preferred_element_type=jnp.float32))
    h7 = jnp.maximum(
        jnp.dot(_bf16(a_ref[...]), _bf16(xw), preferred_element_type=jnp.float32)
        + b7_ref[...], 0.0)
    h1 = jnp.maximum(
        jnp.dot(xin_b, wf1_ref[:win, :], preferred_element_type=jnp.float32)
        + jnp.dot(_bf16(h7), wf1_ref[win:, :], preferred_element_type=jnp.float32)
        + bf1_ref[...], 0.0)
    o_ref[...] = (
        jnp.dot(xin_b, wf2_ref[:win, :], preferred_element_type=jnp.float32)
        + jnp.dot(_bf16(h1), wf2_ref[win:, :], preferred_element_type=jnp.float32)
        + bf2_ref[...])


_VMEM = pl.BlockSpec(memory_space=pltpu.MemorySpace.VMEM)


def _pcall(kernel, out_shapes, *args):
    multi = isinstance(out_shapes[0], (list, tuple))
    shapes = list(out_shapes) if multi else [out_shapes]
    out_shape = tuple(jax.ShapeDtypeStruct(tuple(s), jnp.float32) for s in shapes)
    out_specs = tuple(_VMEM for _ in shapes)
    if not multi:
        out_shape, out_specs = out_shape[0], out_specs[0]
    return pl.pallas_call(
        kernel,
        out_shape=out_shape,
        in_specs=[_VMEM] * len(args),
        out_specs=out_specs,
    )(*args)


# ------------------------------ JAX glue --------------------------------

def gcn_norm_dense(adj_bool):
    # A_hat = D^-1/2 (A + I) D^-1/2
    n = adj_bool.shape[0]
    a = adj_bool.astype(jnp.float32) + jnp.eye(n, dtype=jnp.float32)
    deg = a.sum(axis=1)
    dinv = jnp.where(deg > 0, jax.lax.rsqrt(deg), 0.0)
    return a * dinv[:, None] * dinv[None, :]


def cluster_pool_glue(uv, b_score, adj_bool):
    """ClusterPooling glue: tanh edge scores, contract edges with score > 0,
    merge connected components (exact transitive closure via O(log N) boolean
    matrix squaring), build the dense cluster-assignment matrix.  The coarse
    graph keeps N slots; cluster id = minimum member index."""
    # TODO(synk): PyG ClusterPooling weights the per-cluster aggregation by
    # normalized edge scores; the in-kernel aggregation here is a plain sum.
    n = adj_bool.shape[0]
    u = uv[:, 0:1]
    v = uv[:, 1:2]
    s = jnp.tanh(u + v.T + b_score)
    contract = (s > 0.0) & adj_bool
    contract = contract | contract.T          # both edge directions are scored
    m = contract | jnp.eye(n, dtype=bool)
    reach = m
    for _ in range(max(1, math.ceil(math.log2(max(n, 2))))):
        rf = reach.astype(jnp.float32)
        reach = reach | ((rf @ rf) > 0.0)
    idx = jnp.arange(n, dtype=jnp.int32)
    labels = jnp.min(jnp.where(reach, idx[None, :], n), axis=1).astype(jnp.int32)
    assign = (labels[None, :] == idx[:, None]).astype(jnp.float32)
    adj_f = adj_bool.astype(jnp.float32)
    adj_pool = (assign @ adj_f @ assign.T) > 0.0
    adj_pool = adj_pool & ~jnp.eye(n, dtype=bool)
    return assign, adj_pool, labels


def forward(x, edge_index, pp, *, num_out):
    n, nf = x.shape
    npad = _round_up(n, _SUB)                 # rows only need 8-sublane alignment
    w_in = _round_up(nf, _LANE)
    w_h = pp['conv1_w'].shape[1]              # padded hidden width
    w1 = pp['conv4_w'].shape[0]               # slab width of x1 = [x_in | h1]
    w2 = pp['conv5_w'].shape[0]               # slab width of x2
    w3 = pp['conv6_w'].shape[0]               # slab width of x3

    src, dst = edge_index[:, 0], edge_index[:, 1]
    adj = jnp.zeros((n, n), dtype=bool).at[src, dst].set(True)
    adj = (adj | adj.T) & ~jnp.eye(n, dtype=bool)

    a0 = _pad2(gcn_norm_dense(adj), npad, npad)   # padded once, reused by conv1 & tail
    xin = _pad2(x, npad, w_in)

    # layer 1: conv1 + ReLU + concat + pool1 score projections (single kernel)
    x1, uv1 = _pcall(_gcn_concat_score_kernel, [(npad, w1), (npad, _LANE)],
                     a0, xin, pp['conv1_w'], pp['conv1_b'], pp['pool1_wuv'])
    assign1, adj1, lab1 = cluster_pool_glue(uv1[:n, :2], pp['pool1_bs'], adj)
    a1 = _pad2(gcn_norm_dense(adj1), npad, npad)

    # layer 2: cluster sum-pool + conv4 + ReLU + concat + pool2 scores
    x2, uv2 = _pcall(_pool_gcn_concat_score_kernel, [(npad, w2), (npad, _LANE)],
                     _pad2(assign1, npad, npad), a1, x1,
                     pp['conv4_w'], pp['conv4_b'], pp['pool2_wuv'])
    assign2, adj2, lab2 = cluster_pool_glue(uv2[:n, :2], pp['pool2_bs'], adj1)
    a2 = _pad2(gcn_norm_dense(adj2), npad, npad)

    # layer 3: cluster sum-pool + conv5 + ReLU + concat + pool3 scores
    x3, uv3 = _pcall(_pool_gcn_concat_score_kernel, [(npad, w3), (npad, _LANE)],
                     _pad2(assign2, npad, npad), a2, x2,
                     pp['conv5_w'], pp['conv5_b'], pp['pool3_wuv'])
    assign3, adj3, lab3 = cluster_pool_glue(uv3[:n, :2], pp['pool3_bs'], adj2)
    a3 = _pad2(gcn_norm_dense(adj3), npad, npad)

    # bottleneck: cluster sum-pool + conv6 + ReLU
    h6 = _pcall(_pool_gcn_kernel, (npad, w_h),
                _pad2(assign3, npad, npad), a3, x3, pp['conv6_w'], pp['conv6_b'])

    # ClusterPooling.unpool chain == gather rows by the stored cluster maps
    h = h6[:n]
    h = h[lab3]
    h = h[lab2]
    h = h[lab1]
    h = jnp.pad(h, ((0, npad - n), (0, 0)))

    # tail: conv7 + ReLU + fc1 + ReLU + fc2 with the x_in concats fused
    out = _pcall(_tail_kernel, (npad, pp['fc2_w'].shape[1]),
                 a0, xin, h, pp['conv7_w'], pp['conv7_b'],
                 pp['fc1_w'], pp['fc1_b'], pp['fc2_w'], pp['fc2_b'])
    logits = out[:n, :num_out]
    if num_out == 1:
        # num_classes == 2 -> single logit, sigmoid, flatten
        return jax.nn.sigmoid(logits).reshape(-1)
    return jax.nn.log_softmax(logits, axis=1)


# --------------------------- parameter handling --------------------------

def init_params(key, nf, hidden, num_out):
    def lin_init(k, fi, fo):
        kw, kb = jax.random.split(k)
        bound = 1.0 / jnp.sqrt(jnp.float32(fi))
        w = jax.random.uniform(kw, (fi, fo), jnp.float32, -bound, bound)
        b = jax.random.uniform(kb, (fo,), jnp.float32, -bound, bound)
        return w, b

    keys = jax.random.split(key, 10)
    p = {}
    p['conv1_w'], p['conv1_b'] = lin_init(keys[0], nf, hidden)
    p['pool1_w'], p['pool1_b'] = lin_init(keys[1], 2 * (hidden + nf), 1)
    p['conv4_w'], p['conv4_b'] = lin_init(keys[2], hidden + nf, hidden)
    p['pool2_w'], p['pool2_b'] = lin_init(keys[3], 2 * (2 * hidden + nf), 1)
    p['conv5_w'], p['conv5_b'] = lin_init(keys[4], 2 * hidden + nf, hidden)
    p['pool3_w'], p['pool3_b'] = lin_init(keys[5], 2 * (3 * hidden + nf), 1)
    p['conv6_w'], p['conv6_b'] = lin_init(keys[6], 3 * hidden + nf, hidden)
    p['conv7_w'], p['conv7_b'] = lin_init(keys[7], hidden + nf, hidden)
    p['fc1_w'], p['fc1_b'] = lin_init(keys[8], hidden + nf, hidden)
    p['fc2_w'], p['fc2_b'] = lin_init(keys[9], hidden + nf, num_out)
    return p


def prepare_params(params, nf, hidden):
    """Pad/scatter weights once into the lane-aligned slab layout (bf16),
    biases to f32 (1, 128k) rows.  Done once, outside the jitted forward."""
    h = hidden
    b_in = [nf]
    b1 = [nf, h]
    b2 = [nf, h, h]
    b3 = [nf, h, h, h]

    def conv(name, blocks):
        w = _pad_rows_by_blocks(params[name + '_w'], blocks)
        fo = w.shape[1]
        w = jnp.pad(w, ((0, 0), (0, _round_up(fo, _LANE) - fo)))
        b = params[name + '_b']
        b = jnp.pad(b, (0, _round_up(b.shape[0], _LANE) - b.shape[0])).reshape(1, -1)
        return w.astype(jnp.bfloat16), b.astype(jnp.float32)

    def pool(name, xcat_blocks):
        w = params[name + '_w']                 # (2F, 1): [w_u ; w_v]
        f = w.shape[0] // 2
        wa = _pad_rows_by_blocks(w[:f], xcat_blocks)
        wb = _pad_rows_by_blocks(w[f:], xcat_blocks)
        wuv = jnp.concatenate([wa, wb], axis=1)  # col0 -> u, col1 -> v
        wuv = jnp.pad(wuv, ((0, 0), (0, _LANE - wuv.shape[1])))
        return wuv.astype(jnp.bfloat16), params[name + '_b'].reshape(())

    pp = {}
    pp['conv1_w'], pp['conv1_b'] = conv('conv1', b_in)
    pp['pool1_wuv'], pp['pool1_bs'] = pool('pool1', b1)
    pp['conv4_w'], pp['conv4_b'] = conv('conv4', b1)
    pp['pool2_wuv'], pp['pool2_bs'] = pool('pool2', b2)
    pp['conv5_w'], pp['conv5_b'] = conv('conv5', b2)
    pp['pool3_wuv'], pp['pool3_bs'] = pool('pool3', b3)
    pp['conv6_w'], pp['conv6_b'] = conv('conv6', b3)
    pp['conv7_w'], pp['conv7_b'] = conv('conv7', b1)
    pp['fc1_w'], pp['fc1_b'] = conv('fc1', b1)
    pp['fc2_w'], pp['fc2_b'] = conv('fc2', b1)
    return pp


if __name__ == "__main__":
    key = jax.random.PRNGKey(0)
    node_features, hidden, num_classes = 4, 128, 2
    num_out = 1 if num_classes == 2 else num_classes
    n_nodes = 16

    kx, kp = jax.random.split(key)
    x = jax.random.normal(kx, (n_nodes, node_features), jnp.float32)
    ring = [(i, (i + 1) % n_nodes) for i in range(n_nodes)]
    chords = [(0, 8), (2, 10), (4, 12), (6, 14)]
    edge_index = jnp.array(ring + chords, dtype=jnp.int32)  # (E, 2), data[1] layout

    params = init_params(kp, node_features, hidden, num_out)
    pp = prepare_params(params, node_features, hidden)      # pad + bf16 once

    fwd = jax.jit(functools.partial(forward, num_out=num_out))
    out = fwd(x, edge_index, pp)
    out = jax.block_until_ready(out)
    assert out.shape == (n_nodes,)
    assert bool(jnp.all(jnp.isfinite(out)))
    print("KERNEL_OK")
</pallas_src>

<mosaic_0001>
module attributes {stable_mosaic.version = 11 : i64} {
  func.func @_gcn_concat_score_kernel(%arg0: memref<16x16xf32, #tpu.memory_space<vmem>>, %arg1: memref<16x128xf32, #tpu.memory_space<vmem>>, %arg2: memref<128x128xbf16, #tpu.memory_space<vmem>>, %arg3: memref<1x128xf32, #tpu.memory_space<vmem>>, %arg4: memref<256x128xbf16, #tpu.memory_space<vmem>>, %arg5: memref<16x256xf32, #tpu.memory_space<vmem>>, %arg6: memref<16x128xf32, #tpu.memory_space<vmem>>) attributes {dimension_semantics = [], scalar_prefetch = 0 : i64, scratch_operands = 0 : i64, tpu.core_type = #tpu.core_type<tc>} {
    %c0 = arith.constant 0 : index
    %c0_0 = arith.constant 0 : index
    %0 = vector.load %arg1[%c0, %c0_0] : memref<16x128xf32, #tpu.memory_space<vmem>>, vector<16x128xf32>
    %1 = arith.truncf %0 : vector<16x128xf32> to vector<16x128xbf16>
    %c0_1 = arith.constant 0 : index
    %c0_2 = arith.constant 0 : index
    %2 = vector.load %arg2[%c0_1, %c0_2] : memref<128x128xbf16, #tpu.memory_space<vmem>>, vector<128x128xbf16>
    %cst = arith.constant dense<0.000000e+00> : vector<16x128xf32>
    %3 = tpu.matmul %1, %2, %cst {dimension_numbers = #tpu.dot_dimension_numbers<[1], [0], [0], [1], [0, 0, 1, 1], [], []>} : vector<16x128xbf16>, vector<128x128xbf16>, vector<16x128xf32> -> vector<16x128xf32>
    %c0_3 = arith.constant 0 : index
    %c0_4 = arith.constant 0 : index
    %4 = vector.load %arg0[%c0_3, %c0_4] : memref<16x16xf32, #tpu.memory_space<vmem>>, vector<16x16xf32>
    %5 = arith.truncf %4 : vector<16x16xf32> to vector<16x16xbf16>
    %6 = arith.truncf %3 : vector<16x128xf32> to vector<16x128xbf16>
    %cst_5 = arith.constant dense<0.000000e+00> : vector<16x128xf32>
    %7 = tpu.matmul %5, %6, %cst_5 {dimension_numbers = #tpu.dot_dimension_numbers<[1], [0], [0], [1], [0, 0, 1, 1], [], []>} : vector<16x16xbf16>, vector<16x128xbf16>, vector<16x128xf32> -> vector<16x128xf32>
    %c0_6 = arith.constant 0 : index
    %c0_7 = arith.constant 0 : index
    %8 = vector.load %arg3[%c0_6, %c0_7] : memref<1x128xf32, #tpu.memory_space<vmem>>, vector<1x128xf32>
    %9 = vector.broadcast %8 : vector<1x128xf32> to vector<16x128xf32>
    %10 = arith.addf %7, %9 : vector<16x128xf32>
    %cst_8 = arith.constant 0.000000e+00 : f32
    %11 = vector.broadcast %cst_8 : f32 to vector<16x128xf32>
    %12 = arith.maximumf %10, %11 : vector<16x128xf32>
    %c0_9 = arith.constant 0 : index
    %c0_10 = arith.constant 0 : index
    %13 = vector.load %arg5[%c0_9, %c0_10] : memref<16x256xf32, #tpu.memory_space<vmem>>, vector<16x128xf32>
    tpu.vector_store %arg5[%c0_9, %c0_10], %0 {strides = array<i32>} : memref<16x256xf32, #tpu.memory_space<vmem>>, vector<16x128xf32>,
    %c0_11 = arith.constant 0 : index
    %c128 = arith.constant 128 : index
    %14 = vector.load %arg5[%c0_11, %c128] : memref<16x256xf32, #tpu.memory_space<vmem>>, vector<16x128xf32>
    tpu.vector_store %arg5[%c0_11, %c128], %12 {strides = array<i32>} : memref<16x256xf32, #tpu.memory_space<vmem>>, vector<16x128xf32>,
    %15 = arith.truncf %0 : vector<16x128xf32> to vector<16x128xbf16>
    %c0_12 = arith.constant 0 : index
    %c0_13 = arith.constant 0 : index
    %16 = vector.load %arg4[%c0_12, %c0_13] : memref<256x128xbf16, #tpu.memory_space<vmem>>, vector<128x128xbf16>
    %cst_14 = arith.constant dense<0.000000e+00> : vector<16x128xf32>
    %17 = tpu.matmul %15, %16, %cst_14 {dimension_numbers = #tpu.dot_dimension_numbers<[1], [0], [0], [1], [0, 0, 1, 1], [], []>} : vector<16x128xbf16>, vector<128x128xbf16>, vector<16x128xf32> -> vector<16x128xf32>
    %18 = arith.truncf %12 : vector<16x128xf32> to vector<16x128xbf16>
    %c128_15 = arith.constant 128 : index
    %c0_16 = arith.constant 0 : index
    %19 = vector.load %arg4[%c128_15, %c0_16] : memref<256x128xbf16, #tpu.memory_space<vmem>>, vector<128x128xbf16>
    %cst_17 = arith.constant dense<0.000000e+00> : vector<16x128xf32>
    %20 = tpu.matmul %18, %19, %cst_17 {dimension_numbers = #tpu.dot_dimension_numbers<[1], [0], [0], [1], [0, 0, 1, 1], [], []>} : vector<16x128xbf16>, vector<128x128xbf16>, vector<16x128xf32> -> vector<16x128xf32>
    %21 = arith.addf %17, %20 : vector<16x128xf32>
    %c0_18 = arith.constant 0 : index
    %c0_19 = arith.constant 0 : index
    %22 = vector.load %arg6[%c0_18, %c0_19] : memref<16x128xf32, #tpu.memory_space<vmem>>, vector<16x128xf32>
    tpu.vector_store %arg6[%c0_18, %c0_19], %21 {strides = array<i32>} : memref<16x128xf32, #tpu.memory_space<vmem>>, vector<16x128xf32>,
    return
  }
}

module attributes {stable_mosaic.version = 11 : i64} {
  func.func @_pool_gcn_concat_score_kernel(%arg0: memref<16x16xf32, #tpu.memory_space<vmem>>, %arg1: memref<16x16xf32, #tpu.memory_space<vmem>>, %arg2: memref<16x256xf32, #tpu.memory_space<vmem>>, %arg3: memref<256x128xbf16, #tpu.memory_space<vmem>>, %arg4: memref<1x128xf32, #tpu.memory_space<vmem>>, %arg5: memref<384x128xbf16, #tpu.memory_space<vmem>>, %arg6: memref<16x384xf32, #tpu.memory_space<vmem>>, %arg7: memref<16x128xf32, #tpu.memory_space<vmem>>) attributes {dimension_semantics = [], scalar_prefetch = 0 : i64, scratch_operands = 0 : i64, tpu.core_type = #tpu.core_type<tc>} {
    %c0 = arith.constant 0 : index
    %c0_0 = arith.constant 0 : index
    %0 = vector.load %arg0[%c0, %c0_0] : memref<16x16xf32, #tpu.memory_space<vmem>>, vector<16x16xf32>
    %1 = arith.truncf %0 : vector<16x16xf32> to vector<16x16xbf16>
    %c0_1 = arith.constant 0 : index
    %c0_2 = arith.constant 0 : index
    %2 = vector.load %arg2[%c0_1, %c0_2] : memref<16x256xf32, #tpu.memory_space<vmem>>, vector<16x256xf32>
    %3 = arith.truncf %2 : vector<16x256xf32> to vector<16x256xbf16>
    %cst = arith.constant dense<0.000000e+00> : vector<16x256xf32>
    %4 = tpu.matmul %1, %3, %cst {dimension_numbers = #tpu.dot_dimension_numbers<[1], [0], [0], [1], [0, 0, 1, 1], [], []>} : vector<16x16xbf16>, vector<16x256xbf16>, vector<16x256xf32> -> vector<16x256xf32>
    %5 = arith.truncf %4 : vector<16x256xf32> to vector<16x256xbf16>
    %c0_3 = arith.constant 0 : index
    %c0_4 = arith.constant 0 : index
    %6 = vector.load %arg3[%c0_3, %c0_4] : memref<256x128xbf16, #tpu.memory_space<vmem>>, vector<256x128xbf16>
    %cst_5 = arith.constant dense<0.000000e+00> : vector<16x128xf32>
    %7 = tpu.matmul %5, %6, %cst_5 {dimension_numbers = #tpu.dot_dimension_numbers<[1], [0], [0], [1], [0, 0, 1, 1], [], []>} : vector<16x256xbf16>, vector<256x128xbf16>, vector<16x128xf32> -> vector<16x128xf32>
    %c0_6 = arith.constant 0 : index
    %c0_7 = arith.constant 0 : index
    %8 = vector.load %arg1[%c0_6, %c0_7] : memref<16x16xf32, #tpu.memory_space<vmem>>, vector<16x16xf32>
    %9 = arith.truncf %8 : vector<16x16xf32> to vector<16x16xbf16>
    %10 = arith.truncf %7 : vector<16x128xf32> to vector<16x128xbf16>
    %cst_8 = arith.constant dense<0.000000e+00> : vector<16x128xf32>
    %11 = tpu.matmul %9, %10, %cst_8 {dimension_numbers = #tpu.dot_dimension_numbers<[1], [0], [0], [1], [0, 0, 1, 1], [], []>} : vector<16x16xbf16>, vector<16x128xbf16>, vector<16x128xf32> -> vector<16x128xf32>
    %c0_9 = arith.constant 0 : index
    %c0_10 = arith.constant 0 : index
    %12 = vector.load %arg4[%c0_9, %c0_10] : memref<1x128xf32, #tpu.memory_space<vmem>>, vector<1x128xf32>
    %13 = vector.broadcast %12 : vector<1x128xf32> to vector<16x128xf32>
    %14 = arith.addf %11, %13 : vector<16x128xf32>
    %cst_11 = arith.constant 0.000000e+00 : f32
    %15 = vector.broadcast %cst_11 : f32 to vector<16x128xf32>
    %16 = arith.maximumf %14, %15 : vector<16x128xf32>
    %c0_12 = arith.constant 0 : index
    %c0_13 = arith.constant 0 : index
    %17 = vector.load %arg6[%c0_12, %c0_13] : memref<16x384xf32, #tpu.memory_space<vmem>>, vector<16x256xf32>
    tpu.vector_store %arg6[%c0_12, %c0_13], %4 {strides = array<i32>} : memref<16x384xf32, #tpu.memory_space<vmem>>, vector<16x256xf32>,
    %c0_14 = arith.constant 0 : index
    %c256 = arith.constant 256 : index
    %18 = vector.load %arg6[%c0_14, %c256] : memref<16x384xf32, #tpu.memory_space<vmem>>, vector<16x128xf32>
    tpu.vector_store %arg6[%c0_14, %c256], %16 {strides = array<i32>} : memref<16x384xf32, #tpu.memory_space<vmem>>, vector<16x128xf32>,
    %19 = arith.truncf %4 : vector<16x256xf32> to vector<16x256xbf16>
    %c0_15 = arith.constant 0 : index
    %c0_16 = arith.constant 0 : index
    %20 = vector.load %arg5[%c0_15, %c0_16] : memref<384x128xbf16, #tpu.memory_space<vmem>>, vector<256x128xbf16>
    %cst_17 = arith.constant dense<0.000000e+00> : vector<16x128xf32>
    %21 = tpu.matmul %19, %20, %cst_17 {dimension_numbers = #tpu.dot_dimension_numbers<[1], [0], [0], [1], [0, 0, 1, 1], [], []>} : vector<16x256xbf16>, vector<256x128xbf16>, vector<16x128xf32> -> vector<16x128xf32>
    %22 = arith.truncf %16 : vector<16x128xf32> to vector<16x128xbf16>
    %c256_18 = arith.constant 256 : index
    %c0_19 = arith.constant 0 : index
    %23 = vector.load %arg5[%c256_18, %c0_19] : memref<384x128xbf16, #tpu.memory_space<vmem>>, vector<128x128xbf16>
    %cst_20 = arith.constant dense<0.000000e+00> : vector<16x128xf32>
    %24 = tpu.matmul %22, %23, %cst_20 {dimension_numbers = #tpu.dot_dimension_numbers<[1], [0], [0], [1], [0, 0, 1, 1], [], []>} : vector<16x128xbf16>, vector<128x128xbf16>, vector<16x128xf32> -> vector<16x128xf32>
    %25 = arith.addf %21, %24 : vector<16x128xf32>
    %c0_21 = arith.constant 0 : index
    %c0_22 = arith.constant 0 : index
    %26 = vector.load %arg7[%c0_21, %c0_22] : memref<16x128xf32, #tpu.memory_space<vmem>>, vector<16x128xf32>
    tpu.vector_store %arg7[%c0_21, %c0_22], %25 {strides = array<i32>} : memref<16x128xf32, #tpu.memory_space<vmem>>, vector<16x128xf32>,
    return
  }
}

module attributes {stable_mosaic.version = 11 : i64} {
  func.func @_pool_gcn_concat_score_kernel(%arg0: memref<16x16xf32, #tpu.memory_space<vmem>>, %arg1: memref<16x16xf32, #tpu.memory_space<vmem>>, %arg2: memref<16x384xf32, #tpu.memory_space<vmem>>, %arg3: memref<384x128xbf16, #tpu.memory_space<vmem>>, %arg4: memref<1x128xf32, #tpu.memory_space<vmem>>, %arg5: memref<512x128xbf16, #tpu.memory_space<vmem>>, %arg6: memref<16x512xf32, #tpu.memory_space<vmem>>, %arg7: memref<16x128xf32, #tpu.memory_space<vmem>>) attributes {dimension_semantics = [], scalar_prefetch = 0 : i64, scratch_operands = 0 : i64, tpu.core_type = #tpu.core_type<tc>} {
    %c0 = arith.constant 0 : index
    %c0_0 = arith.constant 0 : index
    %0 = vector.load %arg0[%c0, %c0_0] : memref<16x16xf32, #tpu.memory_space<vmem>>, vector<16x16xf32>
    %1 = arith.truncf %0 : vector<16x16xf32> to vector<16x16xbf16>
    %c0_1 = arith.constant 0 : index
    %c0_2 = arith.constant 0 : index
    %2 = vector.load %arg2[%c0_1, %c0_2] : memref<16x384xf32, #tpu.memory_space<vmem>>, vector<16x384xf32>
    %3 = arith.truncf %2 : vector<16x384xf32> to vector<16x384xbf16>
    %cst = arith.constant dense<0.000000e+00> : vector<16x384xf32>
    %4 = tpu.matmul %1, %3, %cst {dimension_numbers = #tpu.dot_dimension_numbers<[1], [0], [0], [1], [0, 0, 1, 1], [], []>} : vector<16x16xbf16>, vector<16x384xbf16>, vector<16x384xf32> -> vector<16x384xf32>
    %5 = arith.truncf %4 : vector<16x384xf32> to vector<16x384xbf16>
    %c0_3 = arith.constant 0 : index
    %c0_4 = arith.constant 0 : index
    %6 = vector.load %arg3[%c0_3, %c0_4] : memref<384x128xbf16, #tpu.memory_space<vmem>>, vector<384x128xbf16>
    %cst_5 = arith.constant dense<0.000000e+00> : vector<16x128xf32>
    %7 = tpu.matmul %5, %6, %cst_5 {dimension_numbers = #tpu.dot_dimension_numbers<[1], [0], [0], [1], [0, 0, 1, 1], [], []>} : vector<16x384xbf16>, vector<384x128xbf16>, vector<16x128xf32> -> vector<16x128xf32>
    %c0_6 = arith.constant 0 : index
    %c0_7 = arith.constant 0 : index
    %8 = vector.load %arg1[%c0_6, %c0_7] : memref<16x16xf32, #tpu.memory_space<vmem>>, vector<16x16xf32>
    %9 = arith.truncf %8 : vector<16x16xf32> to vector<16x16xbf16>
    %10 = arith.truncf %7 : vector<16x128xf32> to vector<16x128xbf16>
    %cst_8 = arith.constant dense<0.000000e+00> : vector<16x128xf32>
    %11 = tpu.matmul %9, %10, %cst_8 {dimension_numbers = #tpu.dot_dimension_numbers<[1], [0], [0], [1], [0, 0, 1, 1], [], []>} : vector<16x16xbf16>, vector<16x128xbf16>, vector<16x128xf32> -> vector<16x128xf32>
    %c0_9 = arith.constant 0 : index
    %c0_10 = arith.constant 0 : index
    %12 = vector.load %arg4[%c0_9, %c0_10] : memref<1x128xf32, #tpu.memory_space<vmem>>, vector<1x128xf32>
    %13 = vector.broadcast %12 : vector<1x128xf32> to vector<16x128xf32>
    %14 = arith.addf %11, %13 : vector<16x128xf32>
    %cst_11 = arith.constant 0.000000e+00 : f32
    %15 = vector.broadcast %cst_11 : f32 to vector<16x128xf32>
    %16 = arith.maximumf %14, %15 : vector<16x128xf32>
    %c0_12 = arith.constant 0 : index
    %c0_13 = arith.constant 0 : index
    %17 = vector.load %arg6[%c0_12, %c0_13] : memref<16x512xf32, #tpu.memory_space<vmem>>, vector<16x384xf32>
    tpu.vector_store %arg6[%c0_12, %c0_13], %4 {strides = array<i32>} : memref<16x512xf32, #tpu.memory_space<vmem>>, vector<16x384xf32>,
    %c0_14 = arith.constant 0 : index
    %c384 = arith.constant 384 : index
    %18 = vector.load %arg6[%c0_14, %c384] : memref<16x512xf32, #tpu.memory_space<vmem>>, vector<16x128xf32>
    tpu.vector_store %arg6[%c0_14, %c384], %16 {strides = array<i32>} : memref<16x512xf32, #tpu.memory_space<vmem>>, vector<16x128xf32>,
    %19 = arith.truncf %4 : vector<16x384xf32> to vector<16x384xbf16>
    %c0_15 = arith.constant 0 : index
    %c0_16 = arith.constant 0 : index
    %20 = vector.load %arg5[%c0_15, %c0_16] : memref<512x128xbf16, #tpu.memory_space<vmem>>, vector<384x128xbf16>
    %cst_17 = arith.constant dense<0.000000e+00> : vector<16x128xf32>
    %21 = tpu.matmul %19, %20, %cst_17 {dimension_numbers = #tpu.dot_dimension_numbers<[1], [0], [0], [1], [0, 0, 1, 1], [], []>} : vector<16x384xbf16>, vector<384x128xbf16>, vector<16x128xf32> -> vector<16x128xf32>
    %22 = arith.truncf %16 : vector<16x128xf32> to vector<16x128xbf16>
    %c384_18 = arith.constant 384 : index
    %c0_19 = arith.constant 0 : index
    %23 = vector.load %arg5[%c384_18, %c0_19] : memref<512x128xbf16, #tpu.memory_space<vmem>>, vector<128x128xbf16>
    %cst_20 = arith.constant dense<0.000000e+00> : vector<16x128xf32>
    %24 = tpu.matmul %22, %23, %cst_20 {dimension_numbers = #tpu.dot_dimension_numbers<[1], [0], [0], [1], [0, 0, 1, 1], [], []>} : vector<16x128xbf16>, vector<128x128xbf16>, vector<16x128xf32> -> vector<16x128xf32>
    %25 = arith.addf %21, %24 : vector<16x128xf32>
    %c0_21 = arith.constant 0 : index
    %c0_22 = arith.constant 0 : index
    %26 = vector.load %arg7[%c0_21, %c0_22] : memref<16x128xf32, #tpu.memory_space<vmem>>, vector<16x128xf32>
    tpu.vector_store %arg7[%c0_21, %c0_22], %25 {strides = array<i32>} : memref<16x128xf32, #tpu.memory_space<vmem>>, vector<16x128xf32>,
    return
  }
}

module attributes {stable_mosaic.version = 11 : i64} {
  func.func @_pool_gcn_kernel(%arg0: memref<16x16xf32, #tpu.memory_space<vmem>>, %arg1: memref<16x16xf32, #tpu.memory_space<vmem>>, %arg2: memref<16x512xf32, #tpu.memory_space<vmem>>, %arg3: memref<512x128xbf16, #tpu.memory_space<vmem>>, %arg4: memref<1x128xf32, #tpu.memory_space<vmem>>, %arg5: memref<16x128xf32, #tpu.memory_space<vmem>>) attributes {dimension_semantics = [], scalar_prefetch = 0 : i64, scratch_operands = 0 : i64, tpu.core_type = #tpu.core_type<tc>} {
    %c0 = arith.constant 0 : index
    %c0_0 = arith.constant 0 : index
    %0 = vector.load %arg0[%c0, %c0_0] : memref<16x16xf32, #tpu.memory_space<vmem>>, vector<16x16xf32>
    %1 = arith.truncf %0 : vector<16x16xf32> to vector<16x16xbf16>
    %c0_1 = arith.constant 0 : index
    %c0_2 = arith.constant 0 : index
    %2 = vector.load %arg2[%c0_1, %c0_2] : memref<16x512xf32, #tpu.memory_space<vmem>>, vector<16x512xf32>
    %3 = arith.truncf %2 : vector<16x512xf32> to vector<16x512xbf16>
    %cst = arith.constant dense<0.000000e+00> : vector<16x512xf32>
    %4 = tpu.matmul %1, %3, %cst {dimension_numbers = #tpu.dot_dimension_numbers<[1], [0], [0], [1], [0, 0, 1, 1], [], []>} : vector<16x16xbf16>, vector<16x512xbf16>, vector<16x512xf32> -> vector<16x512xf32>
    %5 = arith.truncf %4 : vector<16x512xf32> to vector<16x512xbf16>
    %c0_3 = arith.constant 0 : index
    %c0_4 = arith.constant 0 : index
    %6 = vector.load %arg3[%c0_3, %c0_4] : memref<512x128xbf16, #tpu.memory_space<vmem>>, vector<512x128xbf16>
    %cst_5 = arith.constant dense<0.000000e+00> : vector<16x128xf32>
    %7 = tpu.matmul %5, %6, %cst_5 {dimension_numbers = #tpu.dot_dimension_numbers<[1], [0], [0], [1], [0, 0, 1, 1], [], []>} : vector<16x512xbf16>, vector<512x128xbf16>, vector<16x128xf32> -> vector<16x128xf32>
    %c0_6 = arith.constant 0 : index
    %c0_7 = arith.constant 0 : index
    %8 = vector.load %arg1[%c0_6, %c0_7] : memref<16x16xf32, #tpu.memory_space<vmem>>, vector<16x16xf32>
    %9 = arith.truncf %8 : vector<16x16xf32> to vector<16x16xbf16>
    %10 = arith.truncf %7 : vector<16x128xf32> to vector<16x128xbf16>
    %cst_8 = arith.constant dense<0.000000e+00> : vector<16x128xf32>
    %11 = tpu.matmul %9, %10, %cst_8 {dimension_numbers = #tpu.dot_dimension_numbers<[1], [0], [0], [1], [0, 0, 1, 1], [], []>} : vector<16x16xbf16>, vector<16x128xbf16>, vector<16x128xf32> -> vector<16x128xf32>
    %c0_9 = arith.constant 0 : index
    %c0_10 = arith.constant 0 : index
    %12 = vector.load %arg4[%c0_9, %c0_10] : memref<1x128xf32, #tpu.memory_space<vmem>>, vector<1x128xf32>
    %13 = vector.broadcast %12 : vector<1x128xf32> to vector<16x128xf32>
    %14 = arith.addf %11, %13 : vector<16x128xf32>
    %cst_11 = arith.constant 0.000000e+00 : f32
    %15 = vector.broadcast %cst_11 : f32 to vector<16x128xf32>
    %16 = arith.maximumf %14, %15 : vector<16x128xf32>
    %c0_12 = arith.constant 0 : index
    %c0_13 = arith.constant 0 : index
    %17 = vector.load %arg5[%c0_12, %c0_13] : memref<16x128xf32, #tpu.memory_space<vmem>>, vector<16x128xf32>
    tpu.vector_store %arg5[%c0_12, %c0_13], %16 {strides = array<i32>} : memref<16x128xf32, #tpu.memory_space<vmem>>, vector<16x128xf32>,
    return
  }
}

module attributes {stable_mosaic.version = 11 : i64} {
  func.func @_tail_kernel(%arg0: memref<16x16xf32, #tpu.memory_space<vmem>>, %arg1: memref<16x128xf32, #tpu.memory_space<vmem>>, %arg2: memref<16x128xf32, #tpu.memory_space<vmem>>, %arg3: memref<256x128xbf16, #tpu.memory_space<vmem>>, %arg4: memref<1x128xf32, #tpu.memory_space<vmem>>, %arg5: memref<256x128xbf16, #tpu.memory_space<vmem>>, %arg6: memref<1x128xf32, #tpu.memory_space<vmem>>, %arg7: memref<256x128xbf16, #tpu.memory_space<vmem>>, %arg8: memref<1x128xf32, #tpu.memory_space<vmem>>, %arg9: memref<16x128xf32, #tpu.memory_space<vmem>>) attributes {dimension_semantics = [], scalar_prefetch = 0 : i64, scratch_operands = 0 : i64, tpu.core_type = #tpu.core_type<tc>} {
    %c0 = arith.constant 0 : index
    %c0_0 = arith.constant 0 : index
    %0 = vector.load %arg1[%c0, %c0_0] : memref<16x128xf32, #tpu.memory_space<vmem>>, vector<16x128xf32>
    %1 = arith.truncf %0 : vector<16x128xf32> to vector<16x128xbf16>
    %c0_1 = arith.constant 0 : index
    %c0_2 = arith.constant 0 : index
    %2 = vector.load %arg3[%c0_1, %c0_2] : memref<256x128xbf16, #tpu.memory_space<vmem>>, vector<128x128xbf16>
    %cst = arith.constant dense<0.000000e+00> : vector<16x128xf32>
    %3 = tpu.matmul %1, %2, %cst {dimension_numbers = #tpu.dot_dimension_numbers<[1], [0], [0], [1], [0, 0, 1, 1], [], []>} : vector<16x128xbf16>, vector<128x128xbf16>, vector<16x128xf32> -> vector<16x128xf32>
    %c0_3 = arith.constant 0 : index
    %c0_4 = arith.constant 0 : index
    %4 = vector.load %arg2[%c0_3, %c0_4] : memref<16x128xf32, #tpu.memory_space<vmem>>, vector<16x128xf32>
    %5 = arith.truncf %4 : vector<16x128xf32> to vector<16x128xbf16>
    %c128 = arith.constant 128 : index
    %c0_5 = arith.constant 0 : index
    %6 = vector.load %arg3[%c128, %c0_5] : memref<256x128xbf16, #tpu.memory_space<vmem>>, vector<128x128xbf16>
    %cst_6 = arith.constant dense<0.000000e+00> : vector<16x128xf32>
    %7 = tpu.matmul %5, %6, %cst_6 {dimension_numbers = #tpu.dot_dimension_numbers<[1], [0], [0], [1], [0, 0, 1, 1], [], []>} : vector<16x128xbf16>, vector<128x128xbf16>, vector<16x128xf32> -> vector<16x128xf32>
    %8 = arith.addf %3, %7 : vector<16x128xf32>
    %c0_7 = arith.constant 0 : index
    %c0_8 = arith.constant 0 : index
    %9 = vector.load %arg0[%c0_7, %c0_8] : memref<16x16xf32, #tpu.memory_space<vmem>>, vector<16x16xf32>
    %10 = arith.truncf %9 : vector<16x16xf32> to vector<16x16xbf16>
    %11 = arith.truncf %8 : vector<16x128xf32> to vector<16x128xbf16>
    %cst_9 = arith.constant dense<0.000000e+00> : vector<16x128xf32>
    %12 = tpu.matmul %10, %11, %cst_9 {dimension_numbers = #tpu.dot_dimension_numbers<[1], [0], [0], [1], [0, 0, 1, 1], [], []>} : vector<16x16xbf16>, vector<16x128xbf16>, vector<16x128xf32> -> vector<16x128xf32>
    %c0_10 = arith.constant 0 : index
    %c0_11 = arith.constant 0 : index
    %13 = vector.load %arg4[%c0_10, %c0_11] : memref<1x128xf32, #tpu.memory_space<vmem>>, vector<1x128xf32>
    %14 = vector.broadcast %13 : vector<1x128xf32> to vector<16x128xf32>
    %15 = arith.addf %12, %14 : vector<16x128xf32>
    %cst_12 = arith.constant 0.000000e+00 : f32
    %16 = vector.broadcast %cst_12 : f32 to vector<16x128xf32>
    %17 = arith.maximumf %15, %16 : vector<16x128xf32>
    %c0_13 = arith.constant 0 : index
    %c0_14 = arith.constant 0 : index
    %18 = vector.load %arg5[%c0_13, %c0_14] : memref<256x128xbf16, #tpu.memory_space<vmem>>, vector<128x128xbf16>
    %cst_15 = arith.constant dense<0.000000e+00> : vector<16x128xf32>
    %19 = tpu.matmul %1, %18, %cst_15 {dimension_numbers = #tpu.dot_dimension_numbers<[1], [0], [0], [1], [0, 0, 1, 1], [], []>} : vector<16x128xbf16>, vector<128x128xbf16>, vector<16x128xf32> -> vector<16x128xf32>
    %20 = arith.truncf %17 : vector<16x128xf32> to vector<16x128xbf16>
    %c128_16 = arith.constant 128 : index
    %c0_17 = arith.constant 0 : index
    %21 = vector.load %arg5[%c128_16, %c0_17] : memref<256x128xbf16, #tpu.memory_space<vmem>>, vector<128x128xbf16>
    %cst_18 = arith.constant dense<0.000000e+00> : vector<16x128xf32>
    %22 = tpu.matmul %20, %21, %cst_18 {dimension_numbers = #tpu.dot_dimension_numbers<[1], [0], [0], [1], [0, 0, 1, 1], [], []>} : vector<16x128xbf16>, vector<128x128xbf16>, vector<16x128xf32> -> vector<16x128xf32>
    %23 = arith.addf %19, %22 : vector<16x128xf32>
    %c0_19 = arith.constant 0 : index
    %c0_20 = arith.constant 0 : index
    %24 = vector.load %arg6[%c0_19, %c0_20] : memref<1x128xf32, #tpu.memory_space<vmem>>, vector<1x128xf32>
    %25 = vector.broadcast %24 : vector<1x128xf32> to vector<16x128xf32>
    %26 = arith.addf %23, %25 : vector<16x128xf32>
    %cst_21 = arith.constant 0.000000e+00 : f32
    %27 = vector.broadcast %cst_21 : f32 to vector<16x128xf32>
    %28 = arith.maximumf %26, %27 : vector<16x128xf32>
    %c0_22 = arith.constant 0 : index
    %c0_23 = arith.constant 0 : index
    %29 = vector.load %arg7[%c0_22, %c0_23] : memref<256x128xbf16, #tpu.memory_space<vmem>>, vector<128x128xbf16>
    %cst_24 = arith.constant dense<0.000000e+00> : vector<16x128xf32>
    %30 = tpu.matmul %1, %29, %cst_24 {dimension_numbers = #tpu.dot_dimension_numbers<[1], [0], [0], [1], [0, 0, 1, 1], [], []>} : vector<16x128xbf16>, vector<128x128xbf16>, vector<16x128xf32> -> vector<16x128xf32>
    %31 = arith.truncf %28 : vector<16x128xf32> to vector<16x128xbf16>
    %c128_25 = arith.constant 128 : index
    %c0_26 = arith.constant 0 : index
    %32 = vector.load %arg7[%c128_25, %c0_26] : memref<256x128xbf16, #tpu.memory_space<vmem>>, vector<128x128xbf16>
    %cst_27 = arith.constant dense<0.000000e+00> : vector<16x128xf32>
    %33 = tpu.matmul %31, %32, %cst_27 {dimension_numbers = #tpu.dot_dimension_numbers<[1], [0], [0], [1], [0, 0, 1, 1], [], []>} : vector<16x128xbf16>, vector<128x128xbf16>, vector<16x128xf32> -> vector<16x128xf32>
    %34 = arith.addf %30, %33 : vector<16x128xf32>
    %c0_28 = arith.constant 0 : index
    %c0_29 = arith.constant 0 : index
    %35 = vector.load %arg8[%c0_28, %c0_29] : memref<1x128xf32, #tpu.memory_space<vmem>>, vector<1x128xf32>
    %36 = vector.broadcast %35 : vector<1x128xf32> to vector<16x128xf32>
    %37 = arith.addf %34, %36 : vector<16x128xf32>
    %c0_30 = arith.constant 0 : index
    %c0_31 = arith.constant 0 : index
    %38 = vector.load %arg9[%c0_30, %c0_31] : memref<16x128xf32, #tpu.memory_space<vmem>>, vector<16x128xf32>
    tpu.vector_store %arg9[%c0_30, %c0_31], %37 {strides = array<i32>} : memref<16x128xf32, #tpu.memory_space<vmem>>, vector<16x128xf32>,
    return
  }
}

</mosaic_0001>

<bundles_post_ra>
// kernel: forward.5
= control target key start
LH: loop header
LB: loop body
LE: loop exit
PB: predicated region body
PF: predicated region fallthrough
CT: control target
= control target key end

     0   :  { %v561_v0 = vmov 0.0   ;;  %vm562_vm0 = vmmov 0   ;;  %vm142_vm1 = vcmask 130048   ;;  %s736_s2 = inlined_call_operand.vmem [shape: bf16[128,128], index: 2, kind: input, shape index: {}]   ;;  %s737_s1 = inlined_call_operand.vmem [shape: f32[16,128], index: 1, kind: input, shape index: {}]   ;;  %s738_s5 = inlined_call_operand.vmem [shape: f32[16,256], index: 5, kind: output, shape index: {0}]   ;;  %s739_s4 = inlined_call_operand.vmem [shape: bf16[256,128], index: 4, kind: input, shape index: {}]   ;;  %s740_s0 = inlined_call_operand.vmem [shape: f32[16,16], index: 0, kind: input, shape index: {}]   ;;  %s741_s3 = inlined_call_operand.vmem [shape: f32[1,128], index: 3, kind: input, shape index: {}]   ;;  %s742_s6 = inlined_call_operand.vmem [shape: f32[16,128], index: 6, kind: output, shape index: {1}]  }
   0x1   :  { %469 = vmatprep.subr.bf16.mxu0 %v561_v0  ;;  %v537_v1 = vld [vmem:[%s736_s2 + $0x38] sm:$0xff]   ;;  %485 = vmatprep.mubr.msk.bf16.mxu0 %vm562_vm0, %v561_v0  ;;  %v538_v2 = vld [vmem:[%s736_s2 + $0x30] sm:$0xff]   ;;  %v539_v3 = vld [vmem:[%s736_s2 + $0x28] sm:$0xff]  }
   0x2   :  { %489 = vmatprep.subr.bf16.mxu1 %v561_v0  ;;  %491 = vmatprep.mubr.msk.bf16.mxu1 %vm562_vm0, %v561_v0  ;;  %v23_v4 = vld [vmem:[%s737_s1] sm:$0xff]  ;;  %v24_v5 = vld [vmem:[%s737_s1 + $0x8] sm:$0xff]  ;;  %v541_v7 = vld [vmem:[%s736_s2 + $0x18] sm:$0xff]  }
   0x3   :  { %470 = vmatpush3.bf16.msra.mxu0 %v537_v1  ;;  %189 = vst [vmem:[%s738_s5] sm:$0xff] %v23_v4  ;;  %190 = vst [vmem:[%s738_s5 + $0x10] sm:$0xff] %v24_v5  ;;  %v540_v6 = vld [vmem:[%s736_s2 + $0x20] sm:$0xff]   ;;  %v542_v8 = vld [vmem:[%s736_s2 + $0x10] sm:$0xff]   ;;  %v25_v11 = vpack.c.bf16 %v24_v5, %v23_v4 }
   0x4   :  { %471 = vmatprep.subr.bf16.mxu0 %v561_v0  ;;  %v543_v9 = vld [vmem:[%s736_s2 + $0x8] sm:$0xff]   ;;  %v544_v10 = vld [vmem:[%s736_s2] sm:$0xff]   ;;  %v545_v12 = vld [vmem:[%s739_s4 + $0x38] sm:$0xff]  }
   0x5   :  { %v546_v13 = vld [vmem:[%s739_s4 + $0x30] sm:$0xff]   ;;  %v548_v14 = vld [vmem:[%s739_s4 + $0x28] sm:$0xff]   ;;  %v550_v15 = vld [vmem:[%s739_s4 + $0x20] sm:$0xff]  }
   0x6   :  { %v552_v16 = vld [vmem:[%s739_s4 + $0x18] sm:$0xff]   ;;  %v554_v17 = vld [vmem:[%s739_s4 + $0x10] sm:$0xff]   ;;  %v556_v18 = vld [vmem:[%s739_s4 + $0x8] sm:$0xff]  }
   0x7   :  { %472 = vmatpush3.bf16.msra.mxu0 %v538_v2  ;;  %v131_v21 = vld [vmem:[%s740_s0] sm:$0xff]  ;;  %v132_v22 = vld [vmem:[%s740_s0 + $0x8] sm:$0xff]  ;;  %v547_v27 = vld [vmem:[%s739_s4 + $0x78] sm:$0xff]  }
   0x8   :  { %473 = vmatprep.subr.bf16.mxu0 %v561_v0  ;;  %v133_v26 = vpack.c.bf16 %v132_v22, %v131_v21  ;;  %v549_v28 = vld [vmem:[%s739_s4 + $0x70] sm:$0xff]   ;;  %v551_v29 = vld [vmem:[%s739_s4 + $0x68] sm:$0xff]   ;;  %v553_v30 = vld [vmem:[%s739_s4 + $0x60] sm:$0xff]  }
   0x9   :  { %v555_v31 = vld [vmem:[%s739_s4 + $0x58] sm:$0xff]   ;;  %v557_v32 = vld [vmem:[%s739_s4 + $0x50] sm:$0xff]   ;;  %v558_v33 = vld [vmem:[%s739_s4] sm:$0xff]  }
   0xa   :  { %v559_v34 = vld [vmem:[%s739_s4 + $0x48] sm:$0xff]   ;;  %v560_v35 = vld [vmem:[%s739_s4 + $0x40] sm:$0xff]  }
   0xb   :  { %474 = vmatpush3.bf16.msra.mxu0 %v539_v3  ;;  %v422_v36 = vld [vmem:[%s741_s3] ss:$0 sm:$0xff] }
   0xc   :  { %475 = vmatprep.subr.bf16.mxu0 %v561_v0 }
   0xf   :  { %476 = vmatpush3.bf16.msra.mxu0 %v540_v6 }
  0x10   :  { %477 = vmatprep.subr.bf16.mxu0 %v561_v0 }
  0x13   :  { %478 = vmatpush3.bf16.msra.mxu0 %v541_v7 }
  0x14   :  { %479 = vmatprep.subr.bf16.mxu0 %v561_v0 }
  0x17   :  { %480 = vmatpush3.bf16.msra.mxu0 %v542_v8 }
  0x18   :  { %481 = vmatprep.subr.bf16.mxu0 %v561_v0 }
  0x1b   :  { %482 = vmatpush3.bf16.msra.mxu0 %v543_v9 }
  0x1c   :  { %483 = vmatprep.subr.bf16.mxu0 %v561_v0 }
  0x1f   :  { %484 = vmatpush3.bf16.msra.mxu0 %v544_v10 }
  0x20   :  { %515 = vmatprep.subr.bf16.mxu0 %v561_v0 }
  0x22   :  { %486 = vmatmul.mubr.bf16.vlgmr.msra.gmra.mxu0 %v25_v11 }
  0x23   :  { %531 = vmatprep.mubr.msk.bf16.mxu0 %vm562_vm0, %v561_v0  ;;  %516 = vmatpush3.bf16.msra.mxu0 %v545_v12 }
  0x24   :  { %517 = vmatprep.subr.bf16.mxu0 %v561_v0 }
  0x27   :  { %518 = vmatpush3.bf16.msra.mxu0 %v546_v13 }
  0x28   :  { %519 = vmatprep.subr.bf16.mxu0 %v561_v0 }
  0x2b   :  { %520 = vmatpush3.bf16.msra.mxu0 %v548_v14 }
  0x2c   :  { %521 = vmatprep.subr.bf16.mxu0 %v561_v0 }
  0x2f   :  { %522 = vmatpush3.bf16.msra.mxu0 %v550_v15 }
  0x30   :  { %523 = vmatprep.subr.bf16.mxu0 %v561_v0 }
  0x33   :  { %524 = vmatpush3.bf16.msra.mxu0 %v552_v16 }
  0x34   :  { %525 = vmatprep.subr.bf16.mxu0 %v561_v0 }
  0x37   :  { %526 = vmatpush3.bf16.msra.mxu0 %v554_v17 }
  0x38   :  { %527 = vmatprep.subr.bf16.mxu0 %v561_v0 }
  0x3b   :  { %528 = vmatpush3.bf16.msra.mxu0 %v556_v18 }
  0x3c   :  { %529 = vmatprep.subr.bf16.mxu0 %v561_v0 }
  0x3f   :  { %530 = vmatpush3.bf16.msra.mxu0 %v558_v33 }
  0x42   :  { %532 = vmatmul.mubr.bf16.vlgmr.msra.gmra.mxu0 %v25_v11 }
  0xe2   :  { %v124_v19 = vpop.f32.mrf.mxu0 }
  0xe4   :  { %v487_v20 = vpop.f32.mrf.mxu0 }
  0xe6   :  { %v127_v23 = vpop.f32.mrf.mxu0 }
  0xe7   :  { %v134_v24 = vpack.c.bf16 %v127_v23, %v124_v19 }
  0xe8   :  { %v488_v25 = vpop.f32.mrf.mxu0 }
  0xe9   :  { %490 = vmatpush3.bf16.msra.mxu1 %v134_v24 }
  0xea   :  { %495 = vmatprep.subr.bf16.mxu1 %v561_v0 }
  0xec   :  { %492 = vmatmul.mubr.msk.bf16.vlgmr.msra.gmra.mxu1 %vm142_vm1, %v133_v26 }
  0xed   :  { %496 = vmatpush3.bf16.msra.mxu1 %v547_v27  ;;  %511 = vmatprep.mubr.msk.bf16.mxu1 %vm562_vm0, %v561_v0 }
  0xee   :  { %497 = vmatprep.subr.bf16.mxu1 %v561_v0 }
  0xf1   :  { %498 = vmatpush3.bf16.msra.mxu1 %v549_v28 }
  0xf2   :  { %499 = vmatprep.subr.bf16.mxu1 %v561_v0 }
  0xf5   :  { %500 = vmatpush3.bf16.msra.mxu1 %v551_v29 }
  0xf6   :  { %501 = vmatprep.subr.bf16.mxu1 %v561_v0 }
  0xf9   :  { %502 = vmatpush3.bf16.msra.mxu1 %v553_v30 }
  0xfa   :  { %503 = vmatprep.subr.bf16.mxu1 %v561_v0 }
  0xfd   :  { %504 = vmatpush3.bf16.msra.mxu1 %v555_v31 }
  0xfe   :  { %505 = vmatprep.subr.bf16.mxu1 %v561_v0 }
 0x101   :  { %506 = vmatpush3.bf16.msra.mxu1 %v557_v32 }
 0x102   :  { %507 = vmatprep.subr.bf16.mxu1 %v561_v0  ;;  %v397_v46 = vpop.f32.mrf.mxu0 }
 0x104   :  { %v533_v47 = vpop.f32.mrf.mxu0 }
 0x105   :  { %508 = vmatpush3.bf16.msra.mxu1 %v559_v34 }
 0x106   :  { %509 = vmatprep.subr.bf16.mxu1 %v561_v0  ;;  %v400_v48 = vpop.f32.mrf.mxu0 }
 0x108   :  { %v534_v49 = vpop.f32.mrf.mxu0 }
 0x109   :  { %510 = vmatpush3.bf16.msra.mxu1 %v560_v35 }
 0x1ac   :  { %v180_v37 = vpop.f32.mrf.mxu1 }
 0x1ad   :  { %v181_v38 = vadd.f32 %v422_v36, %v180_v37 }
 0x1ae   :  { %v493_v39 = vpop.f32.mrf.mxu1 }
 0x1af   :  { %v187_v40 = vmax.f32 %v181_v38, 0.0 }
 0x1b0   :  { %v183_v41 = vpop.f32.mrf.mxu1 }
 0x1b1   :  { %191 = vst [vmem:[%s738_s5 + $0x8] sm:$0xff] %v187_v40  ;;  %v184_v42 = vadd.f32 %v422_v36, %v183_v41 }
 0x1b2   :  { %v494_v43 = vpop.f32.mrf.mxu1 }
 0x1b3   :  { %v188_v44 = vmax.f32 %v184_v42, 0.0 }
 0x1b5   :  { %192 = vst [vmem:[%s738_s5 + $0x18] sm:$0xff] %v188_v44  ;;  %v209_v45 = vpack.c.bf16 %v188_v44, %v187_v40 }
 0x1b7   :  { %512 = vmatmul.mubr.bf16.vlgmr.msra.gmra.mxu1 %v209_v45 }
 0x277   :  { %v308_v50 = vpop.f32.mrf.mxu1 }
 0x278   :  { %v398_v51 = vadd.f32 %v397_v46, %v308_v50 }
 0x279   :  { %v513_v52 = vpop.f32.mrf.mxu1 }
 0x27a   :  { %404 = vst [vmem:[%s742_s6] sm:$0xff] %v398_v51 }
 0x27b   :  { %v311_v53 = vpop.f32.mrf.mxu1 }
 0x27c   :  { %v401_v54 = vadd.f32 %v400_v48, %v311_v53 }
 0x27d   :  { %v514_v55 = vpop.f32.mrf.mxu1 }
 0x27e   :  { %405 = vst [vmem:[%s742_s6 + $0x8] sm:$0xff] %v401_v54 }

// kernel: forward.6
= control target key start
LH: loop header
LB: loop body
LE: loop exit
PB: predicated region body
PF: predicated region fallthrough
CT: control target
= control target key end

     0   :  { %v768_v3 = vmov 0   ;;  %vm35_vm0 = vcmask 130048   ;;  %v769_v48 = vmov 0.0   ;;  %vm770_vm1 = vmmov 0   ;;  %s986_s2 = inlined_call_operand.vmem [shape: f32[16,256], index: 2, kind: input, shape index: {}]   ;;  %s987_s0 = inlined_call_operand.vmem [shape: f32[16,16], index: 0, kind: input, shape index: {}]   ;;  %s988_s3 = inlined_call_operand.vmem [shape: bf16[256,128], index: 3, kind: input, shape index: {}]   ;;  %s989_s5 = inlined_call_operand.vmem [shape: bf16[384,128], index: 5, kind: input, shape index: {}]   ;;  %s990_s6 = inlined_call_operand.vmem [shape: f32[16,384], index: 6, kind: output, shape index: {0}]   ;;  %s991_s1 = inlined_call_operand.vmem [shape: f32[16,16], index: 1, kind: input, shape index: {}]   ;;  %s992_s4 = inlined_call_operand.vmem [shape: f32[1,128], index: 4, kind: input, shape index: {}]   ;;  %s993_s7 = inlined_call_operand.vmem [shape: f32[16,128], index: 7, kind: output, shape index: {1}]  }
   0x1   :  { %v30_v0 = vld [vmem:[%s986_s2 + $0x8] sm:$0xff]  ;;  %v32_v1 = vld [vmem:[%s986_s2 + $0x18] sm:$0xff]  ;;  %v29_v2 = vld [vmem:[%s986_s2] sm:$0xff]  ;;  %71 = vmatprep.mubr.bf16.mxu0 %v768_v3 }
   0x2   :  { %v34_v4 = vpack.c.bf16 %v32_v1, %v30_v0  ;;  %v31_v5 = vld [vmem:[%s986_s2 + $0x10] sm:$0xff]  ;;  %v26_v6 = vld [vmem:[%s987_s0] sm:$0xff]  ;;  %v27_v7 = vld [vmem:[%s987_s0 + $0x8] sm:$0xff] }
   0x3   :  { %v33_v8 = vpack.c.bf16 %v31_v5, %v29_v2  ;;  %v728_v9 = vld [vmem:[%s988_s3 + $0x78] sm:$0xff]   ;;  %v28_v10 = vpack.c.bf16 %v27_v7, %v26_v6  ;;  %v730_v12 = vld [vmem:[%s988_s3 + $0x70] sm:$0xff]   ;;  %v732_v14 = vld [vmem:[%s988_s3 + $0x68] sm:$0xff]  }
   0x4   :  { %53 = vmatprep.subr.bf16.mxu0 %v34_v4  ;;  %v729_v11 = vld [vmem:[%s988_s3 + $0x38] sm:$0xff]   ;;  %644 = vmatprep.subr.bf16.mxu1 %v728_v9  ;;  %v731_v13 = vld [vmem:[%s988_s3 + $0x30] sm:$0xff]   ;;  %v733_v15 = vld [vmem:[%s988_s3 + $0x28] sm:$0xff]  }
   0x5   :  { %54 = vmatpush1.bf16.msra.mxu0 %v33_v8  ;;  %645 = vmatpush3.bf16.msra.mxu1 %v729_v11  ;;  %v734_v16 = vld [vmem:[%s988_s3 + $0x60] sm:$0xff]   ;;  %v736_v18 = vld [vmem:[%s988_s3 + $0x58] sm:$0xff]   ;;  %v738_v20 = vld [vmem:[%s988_s3 + $0x50] sm:$0xff]  }
   0x6   :  { %646 = vmatprep.subr.bf16.mxu1 %v730_v12  ;;  %v735_v17 = vld [vmem:[%s988_s3 + $0x20] sm:$0xff]   ;;  %v737_v19 = vld [vmem:[%s988_s3 + $0x18] sm:$0xff]   ;;  %v739_v21 = vld [vmem:[%s988_s3 + $0x10] sm:$0xff]   ;;  %699 = vmatprep.subr.bf16.mxu0 %v769_v48 }
   0x7   :  { %v740_v22 = vld [vmem:[%s988_s3 + $0x48] sm:$0xff]   ;;  %v742_v24 = vld [vmem:[%s988_s3 + $0x40] sm:$0xff]   ;;  %v744_v26 = vld [vmem:[%s989_s5 + $0x78] sm:$0xff]  }
   0x8   :  { %601 = vmatmul.mubr.msk.bf16.vlgmr.msra.gmra.mxu0 %vm35_vm0, %v28_v10  ;;  %v741_v23 = vld [vmem:[%s988_s3 + $0x8] sm:$0xff]   ;;  %v743_v25 = vld [vmem:[%s988_s3] sm:$0xff]   ;;  %v745_v32 = vld [vmem:[%s989_s5 + $0x38] sm:$0xff]  }
   0x9   :  { %647 = vmatpush3.bf16.msra.mxu1 %v731_v13  ;;  %v746_v34 = vld [vmem:[%s989_s5 + $0x70] sm:$0xff]   ;;  %v748_v36 = vld [vmem:[%s989_s5 + $0x68] sm:$0xff]   ;;  %v750_v38 = vld [vmem:[%s989_s5 + $0x60] sm:$0xff]   ;;  %701 = vmatprep.mubr.msk.bf16.mxu0 %vm770_vm1, %v769_v48 }
   0xa   :  { %648 = vmatprep.subr.bf16.mxu1 %v732_v14  ;;  %v747_v35 = vld [vmem:[%s989_s5 + $0x30] sm:$0xff]   ;;  %v749_v37 = vld [vmem:[%s989_s5 + $0x28] sm:$0xff]   ;;  %v751_v39 = vld [vmem:[%s989_s5 + $0x20] sm:$0xff]  }
   0xb   :  { %v752_v40 = vld [vmem:[%s989_s5 + $0x58] sm:$0xff]   ;;  %v754_v42 = vld [vmem:[%s989_s5 + $0x50] sm:$0xff]   ;;  %v756_v44 = vld [vmem:[%s989_s5 + $0x48] sm:$0xff]  }
   0xc   :  { %v753_v41 = vld [vmem:[%s989_s5 + $0x18] sm:$0xff]   ;;  %v755_v43 = vld [vmem:[%s989_s5 + $0x10] sm:$0xff]   ;;  %v757_v45 = vld [vmem:[%s989_s5 + $0x8] sm:$0xff]  }
   0xd   :  { %649 = vmatpush3.bf16.msra.mxu1 %v733_v15  ;;  %v758_v46 = vld [vmem:[%s989_s5 + $0x40] sm:$0xff]   ;;  %v254_v56 = vld [vmem:[%s991_s1 + $0x8] sm:$0xff]  ;;  %v760_v59 = vld [vmem:[%s989_s5 + $0xb8] sm:$0xff]  }
   0xe   :  { %650 = vmatprep.subr.bf16.mxu1 %v734_v16  ;;  %v759_v47 = vld [vmem:[%s989_s5] sm:$0xff]   ;;  %v761_v60 = vld [vmem:[%s989_s5 + $0xb0] sm:$0xff]   ;;  %v762_v61 = vld [vmem:[%s989_s5 + $0xa8] sm:$0xff]  }
   0xf   :  { %v253_v55 = vld [vmem:[%s991_s1] sm:$0xff]  ;;  %v764_v63 = vld [vmem:[%s989_s5 + $0x98] sm:$0xff]   ;;  %v765_v0 = vld [vmem:[%s989_s5 + $0x90] sm:$0xff]  }
  0x10   :  { %v255_v58 = vpack.c.bf16 %v254_v56, %v253_v55  ;;  %v763_v62 = vld [vmem:[%s989_s5 + $0xa0] sm:$0xff]   ;;  %v766_v1 = vld [vmem:[%s989_s5 + $0x88] sm:$0xff]  }
  0x11   :  { %651 = vmatpush3.bf16.msra.mxu1 %v735_v17  ;;  %v767_v2 = vld [vmem:[%s989_s5 + $0x80] sm:$0xff]  }
  0x12   :  { %652 = vmatprep.subr.bf16.mxu1 %v736_v18  ;;  %v618_v3 = vld [vmem:[%s992_s4] ss:$0 sm:$0xff] }
  0x15   :  { %653 = vmatpush3.bf16.msra.mxu1 %v737_v19 }
  0x16   :  { %654 = vmatprep.subr.bf16.mxu1 %v738_v20 }
  0x19   :  { %655 = vmatpush3.bf16.msra.mxu1 %v739_v21 }
  0x1a   :  { %656 = vmatprep.subr.bf16.mxu1 %v740_v22 }
  0x1d   :  { %657 = vmatpush3.bf16.msra.mxu1 %v741_v23 }
  0x1e   :  { %658 = vmatprep.subr.bf16.mxu1 %v742_v24 }
  0x21   :  { %659 = vmatpush3.bf16.msra.mxu1 %v743_v25 }
  0x22   :  { %677 = vmatprep.subr.bf16.mxu1 %v744_v26 }
  0xc8   :  { %v73_v27 = vpop.f32.mrf.mxu0 }
  0xc9   :  { %310 = vst [vmem:[%s990_s6] sm:$0xff] %v73_v27 }
  0xca   :  { %v75_v28 = vpop.f32.mrf.mxu0 }
  0xcb   :  { %311 = vst [vmem:[%s990_s6 + $0x8] sm:$0xff] %v75_v28 }
  0xcc   :  { %v77_v29 = vpop.f32.mrf.mxu0 }
  0xcd   :  { %312 = vst [vmem:[%s990_s6 + $0x18] sm:$0xff] %v77_v29  ;;  %v82_v33 = vpack.c.bf16 %v77_v29, %v73_v27 }
  0xce   :  { %v79_v30 = vpop.f32.mrf.mxu0 }
  0xcf   :  { %313 = vst [vmem:[%s990_s6 + $0x20] sm:$0xff] %v79_v30  ;;  %v83_v31 = vpack.c.bf16 %v79_v30, %v75_v28 }
  0xd1   :  { %244 = vmatprep.mubr.bf16.mxu1 %v83_v31 }
  0xd2   :  { %245 = vmatmul.mubr.bf16.vlgmr.msra.gmra.mxu1 %v82_v33 }
  0xd3   :  { %678 = vmatpush3.bf16.msra.mxu1 %v745_v32  ;;  %582 = vmatprep.mubr.bf16.mxu1 %v83_v31 }
  0xd4   :  { %679 = vmatprep.subr.bf16.mxu1 %v746_v34 }
  0xd7   :  { %680 = vmatpush3.bf16.msra.mxu1 %v747_v35 }
  0xd8   :  { %681 = vmatprep.subr.bf16.mxu1 %v748_v36 }
  0xdb   :  { %682 = vmatpush3.bf16.msra.mxu1 %v749_v37 }
  0xdc   :  { %683 = vmatprep.subr.bf16.mxu1 %v750_v38 }
  0xdf   :  { %684 = vmatpush3.bf16.msra.mxu1 %v751_v39 }
  0xe0   :  { %685 = vmatprep.subr.bf16.mxu1 %v752_v40 }
  0xe3   :  { %686 = vmatpush3.bf16.msra.mxu1 %v753_v41 }
  0xe4   :  { %687 = vmatprep.subr.bf16.mxu1 %v754_v42 }
  0xe7   :  { %688 = vmatpush3.bf16.msra.mxu1 %v755_v43 }
  0xe8   :  { %689 = vmatprep.subr.bf16.mxu1 %v756_v44 }
  0xeb   :  { %690 = vmatpush3.bf16.msra.mxu1 %v757_v45 }
  0xec   :  { %691 = vmatprep.subr.bf16.mxu1 %v758_v46 }
  0xef   :  { %692 = vmatpush3.bf16.msra.mxu1 %v759_v47 }
  0xf2   :  { %583 = vmatmul.mubr.bf16.vlgmr.msra.gmra.mxu1 %v82_v33 }
 0x192   :  { %v660_v49 = vpop.f32.mrf.mxu1 }
 0x194   :  { %v661_v50 = vpop.f32.mrf.mxu1 }
 0x195   :  { %v662_v53 = vadd.f32 %v661_v50, %v660_v49 }
 0x196   :  { %v663_v51 = vpop.f32.mrf.mxu1 }
 0x198   :  { %v664_v52 = vpop.f32.mrf.mxu1 }
 0x199   :  { %v665_v54 = vadd.f32 %v664_v52, %v663_v51 }
 0x19b   :  { %v256_v57 = vpack.c.bf16 %v665_v54, %v662_v53 }
 0x19d   :  { %700 = vmatpush3.bf16.msra.mxu0 %v256_v57 }
 0x19e   :  { %705 = vmatprep.subr.bf16.mxu0 %v769_v48 }
 0x1a0   :  { %702 = vmatmul.mubr.msk.bf16.vlgmr.msra.gmra.mxu0 %vm35_vm0, %v255_v58 }
 0x1a1   :  { %706 = vmatpush3.bf16.msra.mxu0 %v760_v59  ;;  %721 = vmatprep.mubr.msk.bf16.mxu0 %vm770_vm1, %v769_v48 }
 0x1a2   :  { %707 = vmatprep.subr.bf16.mxu0 %v769_v48 }
 0x1a5   :  { %708 = vmatpush3.bf16.msra.mxu0 %v761_v60 }
 0x1a6   :  { %709 = vmatprep.subr.bf16.mxu0 %v769_v48 }
 0x1a9   :  { %710 = vmatpush3.bf16.msra.mxu0 %v762_v61 }
 0x1aa   :  { %711 = vmatprep.subr.bf16.mxu0 %v769_v48 }
 0x1ad   :  { %712 = vmatpush3.bf16.msra.mxu0 %v763_v62 }
 0x1ae   :  { %713 = vmatprep.subr.bf16.mxu0 %v769_v48 }
 0x1b1   :  { %714 = vmatpush3.bf16.msra.mxu0 %v764_v63 }
 0x1b2   :  { %715 = vmatprep.subr.bf16.mxu0 %v769_v48  ;;  %v693_v13 = vpop.f32.mrf.mxu1 }
 0x1b4   :  { %v694_v14 = vpop.f32.mrf.mxu1 }
 0x1b5   :  { %716 = vmatpush3.bf16.msra.mxu0 %v765_v0  ;;  %v695_v16 = vadd.f32 %v694_v14, %v693_v13 }
 0x1b6   :  { %717 = vmatprep.subr.bf16.mxu0 %v769_v48  ;;  %v696_v15 = vpop.f32.mrf.mxu1 }
 0x1b8   :  { %v697_v17 = vpop.f32.mrf.mxu1 }
 0x1b9   :  { %718 = vmatpush3.bf16.msra.mxu0 %v766_v1  ;;  %v698_v21 = vadd.f32 %v697_v17, %v696_v15 }
 0x1ba   :  { %719 = vmatprep.subr.bf16.mxu0 %v769_v48 }
 0x1bd   :  { %720 = vmatpush3.bf16.msra.mxu0 %v767_v2 }
 0x260   :  { %v301_v4 = vpop.f32.mrf.mxu0 }
 0x261   :  { %v302_v5 = vadd.f32 %v618_v3, %v301_v4 }
 0x262   :  { %v703_v6 = vpop.f32.mrf.mxu0 }
 0x263   :  { %v308_v7 = vmax.f32 %v302_v5, 0.0 }
 0x264   :  { %v304_v8 = vpop.f32.mrf.mxu0 }
 0x265   :  { %314 = vst [vmem:[%s990_s6 + $0x10] sm:$0xff] %v308_v7  ;;  %v305_v9 = vadd.f32 %v618_v3, %v304_v8 }
 0x266   :  { %v704_v10 = vpop.f32.mrf.mxu0 }
 0x267   :  { %v309_v11 = vmax.f32 %v305_v9, 0.0 }
 0x269   :  { %315 = vst [vmem:[%s990_s6 + $0x28] sm:$0xff] %v309_v11  ;;  %v348_v12 = vpack.c.bf16 %v309_v11, %v308_v7 }
 0x26b   :  { %722 = vmatmul.mubr.bf16.vlgmr.msra.gmra.mxu0 %v348_v12 }
 0x32b   :  { %v447_v18 = vpop.f32.mrf.mxu0 }
 0x32c   :  { %v585_v19 = vadd.f32 %v695_v16, %v447_v18 }
 0x32d   :  { %v723_v20 = vpop.f32.mrf.mxu0 }
 0x32e   :  { %591 = vst [vmem:[%s993_s7] sm:$0xff] %v585_v19 }
 0x32f   :  { %v450_v22 = vpop.f32.mrf.mxu0 }
 0x330   :  { %v588_v23 = vadd.f32 %v698_v21, %v450_v22 }
 0x331   :  { %v724_v24 = vpop.f32.mrf.mxu0 }
 0x332   :  { %592 = vst [vmem:[%s993_s7 + $0x8] sm:$0xff] %v588_v23 }

// kernel: forward.8
= control target key start
LH: loop header
LB: loop body
LE: loop exit
PB: predicated region body
PF: predicated region fallthrough
CT: control target
= control target key end

     0   :  { %v654_v3 = vmov 0   ;;  %vm36_vm0 = vcmask 130048   ;;  %v655_v60 = vmov 0.0   ;;  %vm656_vm1 = vmmov 0   ;;  %s831_s2 = inlined_call_operand.vmem [shape: f32[16,512], index: 2, kind: input, shape index: {}]   ;;  %s832_s0 = inlined_call_operand.vmem [shape: f32[16,16], index: 0, kind: input, shape index: {}]   ;;  %s833_s3 = inlined_call_operand.vmem [shape: bf16[512,128], index: 3, kind: input, shape index: {}]   ;;  %s834_s1 = inlined_call_operand.vmem [shape: f32[16,16], index: 1, kind: input, shape index: {}]   ;;  %s835_s4 = inlined_call_operand.vmem [shape: f32[1,128], index: 4, kind: input, shape index: {}]   ;;  %s836_s5 = inlined_call_operand.vmem [shape: f32[16,128], index: 5, kind: output, shape index: {}]  }
   0x1   :  { %v25_v0 = vld [vmem:[%s831_s2 + $0x8] sm:$0xff]  ;;  %v27_v2 = vld [vmem:[%s831_s2 + $0x18] sm:$0xff]  ;;  %72 = vmatprep.mubr.bf16.mxu0 %v654_v3  ;;  %115 = vmatprep.mubr.bf16.mxu1 %v654_v3  ;;  %v24_v6 = vld [vmem:[%s831_s2] sm:$0xff] }
   0x2   :  { %v29_v1 = vld [vmem:[%s831_s2 + $0x28] sm:$0xff]  ;;  %v31_v5 = vld [vmem:[%s831_s2 + $0x38] sm:$0xff]  ;;  %v28_v7 = vld [vmem:[%s831_s2 + $0x20] sm:$0xff] }
   0x3   :  { %v33_v4 = vpack.c.bf16 %v29_v1, %v25_v0  ;;  %v35_v8 = vpack.c.bf16 %v31_v5, %v27_v2  ;;  %v32_v9 = vpack.c.bf16 %v28_v7, %v24_v6  ;;  %v26_v10 = vld [vmem:[%s831_s2 + $0x10] sm:$0xff]  ;;  %v21_v12 = vld [vmem:[%s832_s0] sm:$0xff]  ;;  %v22_v14 = vld [vmem:[%s832_s0 + $0x8] sm:$0xff] }
   0x4   :  { %v30_v11 = vld [vmem:[%s831_s2 + $0x30] sm:$0xff]  ;;  %v23_v15 = vpack.c.bf16 %v22_v14, %v21_v12  ;;  %v622_v16 = vld [vmem:[%s833_s3 + $0x78] sm:$0xff]   ;;  %v630_v24 = vld [vmem:[%s833_s3 + $0x68] sm:$0xff]  }
   0x5   :  { %54 = vmatprep.subr.bf16.mxu0 %v33_v4  ;;  %v34_v13 = vpack.c.bf16 %v30_v11, %v26_v10  ;;  %97 = vmatprep.subr.bf16.mxu1 %v35_v8  ;;  %v623_v17 = vld [vmem:[%s833_s3 + $0xf8] sm:$0xff]   ;;  %v626_v20 = vld [vmem:[%s833_s3 + $0x70] sm:$0xff]   ;;  %v631_v25 = vld [vmem:[%s833_s3 + $0xe8] sm:$0xff]  }
   0x6   :  { %55 = vmatpush1.bf16.msra.mxu0 %v32_v9  ;;  %v624_v18 = vld [vmem:[%s833_s3 + $0x38] sm:$0xff]   ;;  %v627_v21 = vld [vmem:[%s833_s3 + $0xf0] sm:$0xff]   ;;  %v632_v26 = vld [vmem:[%s833_s3 + $0x28] sm:$0xff]  }
   0x7   :  { %98 = vmatpush1.bf16.msra.mxu1 %v34_v13  ;;  %567 = vmatprep.subr.bf16.mxu0 %v622_v16  ;;  %v625_v19 = vld [vmem:[%s833_s3 + $0xb8] sm:$0xff]   ;;  %v628_v22 = vld [vmem:[%s833_s3 + $0x30] sm:$0xff]   ;;  %v633_v27 = vld [vmem:[%s833_s3 + $0xa8] sm:$0xff]  }
   0x8   :  { %589 = vmatprep.subr.bf16.mxu1 %v623_v17  ;;  %v629_v23 = vld [vmem:[%s833_s3 + $0xb0] sm:$0xff]   ;;  %v634_v28 = vld [vmem:[%s833_s3 + $0x60] sm:$0xff]   ;;  %v638_v32 = vld [vmem:[%s833_s3 + $0x58] sm:$0xff]  }
   0x9   :  { %531 = vmatmul.mubr.msk.bf16.vlgmr.msra.gmra.mxu0 %vm36_vm0, %v23_v15  ;;  %v635_v29 = vld [vmem:[%s833_s3 + $0xe0] sm:$0xff]   ;;  %v639_v33 = vld [vmem:[%s833_s3 + $0xd8] sm:$0xff]   ;;  %v642_v36 = vld [vmem:[%s833_s3 + $0x50] sm:$0xff]  }
   0xa   :  { %532 = vmatmul.mubr.msk.bf16.vlgmr.msra.gmra.mxu1 %vm36_vm0, %v23_v15  ;;  %568 = vmatpush3.bf16.msra.mxu0 %v624_v18  ;;  %v636_v30 = vld [vmem:[%s833_s3 + $0x20] sm:$0xff]   ;;  %v640_v34 = vld [vmem:[%s833_s3 + $0x18] sm:$0xff]   ;;  %v643_v37 = vld [vmem:[%s833_s3 + $0xd0] sm:$0xff]  }
   0xb   :  { %590 = vmatpush3.bf16.msra.mxu1 %v625_v19  ;;  %569 = vmatprep.subr.bf16.mxu0 %v626_v20  ;;  %v637_v31 = vld [vmem:[%s833_s3 + $0xa0] sm:$0xff]   ;;  %v641_v35 = vld [vmem:[%s833_s3 + $0x98] sm:$0xff]   ;;  %v644_v38 = vld [vmem:[%s833_s3 + $0x10] sm:$0xff]  }
   0xc   :  { %591 = vmatprep.subr.bf16.mxu1 %v627_v21  ;;  %v645_v39 = vld [vmem:[%s833_s3 + $0x90] sm:$0xff]   ;;  %v646_v40 = vld [vmem:[%s833_s3 + $0x48] sm:$0xff]   ;;  %v650_v44 = vld [vmem:[%s833_s3 + $0x40] sm:$0xff]  }
   0xd   :  { %v647_v41 = vld [vmem:[%s833_s3 + $0xc8] sm:$0xff]   ;;  %v651_v45 = vld [vmem:[%s833_s3 + $0xc0] sm:$0xff]  }
   0xe   :  { %570 = vmatpush3.bf16.msra.mxu0 %v628_v22  ;;  %v648_v42 = vld [vmem:[%s833_s3 + $0x8] sm:$0xff]   ;;  %v652_v46 = vld [vmem:[%s833_s3] sm:$0xff]  }
   0xf   :  { %592 = vmatpush3.bf16.msra.mxu1 %v629_v23  ;;  %571 = vmatprep.subr.bf16.mxu0 %v630_v24  ;;  %v649_v43 = vld [vmem:[%s833_s3 + $0x88] sm:$0xff]   ;;  %v653_v47 = vld [vmem:[%s833_s3 + $0x80] sm:$0xff]  }
  0x10   :  { %593 = vmatprep.subr.bf16.mxu1 %v631_v25  ;;  %v468_v11 = vld [vmem:[%s834_s1] sm:$0xff]  ;;  %v469_v12 = vld [vmem:[%s834_s1 + $0x8] sm:$0xff] }
  0x11   :  { %v470_v14 = vpack.c.bf16 %v469_v12, %v468_v11  ;;  %v565_v15 = vld [vmem:[%s835_s4] ss:$0 sm:$0xff] }
  0x12   :  { %572 = vmatpush3.bf16.msra.mxu0 %v632_v26 }
  0x13   :  { %594 = vmatpush3.bf16.msra.mxu1 %v633_v27  ;;  %573 = vmatprep.subr.bf16.mxu0 %v634_v28 }
  0x14   :  { %595 = vmatprep.subr.bf16.mxu1 %v635_v29 }
  0x16   :  { %574 = vmatpush3.bf16.msra.mxu0 %v636_v30 }
  0x17   :  { %596 = vmatpush3.bf16.msra.mxu1 %v637_v31  ;;  %575 = vmatprep.subr.bf16.mxu0 %v638_v32 }
  0x18   :  { %597 = vmatprep.subr.bf16.mxu1 %v639_v33 }
  0x1a   :  { %576 = vmatpush3.bf16.msra.mxu0 %v640_v34 }
  0x1b   :  { %598 = vmatpush3.bf16.msra.mxu1 %v641_v35  ;;  %577 = vmatprep.subr.bf16.mxu0 %v642_v36 }
  0x1c   :  { %599 = vmatprep.subr.bf16.mxu1 %v643_v37 }
  0x1e   :  { %578 = vmatpush3.bf16.msra.mxu0 %v644_v38 }
  0x1f   :  { %600 = vmatpush3.bf16.msra.mxu1 %v645_v39  ;;  %579 = vmatprep.subr.bf16.mxu0 %v646_v40 }
  0x20   :  { %601 = vmatprep.subr.bf16.mxu1 %v647_v41 }
  0x22   :  { %580 = vmatpush3.bf16.msra.mxu0 %v648_v42 }
  0x23   :  { %602 = vmatpush3.bf16.msra.mxu1 %v649_v43  ;;  %581 = vmatprep.subr.bf16.mxu0 %v650_v44 }
  0x24   :  { %603 = vmatprep.subr.bf16.mxu1 %v651_v45 }
  0x26   :  { %582 = vmatpush3.bf16.msra.mxu0 %v652_v46 }
  0x27   :  { %604 = vmatpush3.bf16.msra.mxu1 %v653_v47  ;;  %613 = vmatprep.subr.bf16.mxu0 %v655_v60 }
  0xc9   :  { %v74_v48 = vpop.f32.mrf.mxu0 }
  0xca   :  { %v117_v49 = vpop.f32.mrf.mxu1 }
  0xcb   :  { %v76_v50 = vpop.f32.mrf.mxu0 }
  0xcc   :  { %v119_v51 = vpop.f32.mrf.mxu1 }
  0xcd   :  { %v78_v52 = vpop.f32.mrf.mxu0 }
  0xce   :  { %v121_v53 = vpop.f32.mrf.mxu1  ;;  %v126_v57 = vpack.c.bf16 %v78_v52, %v74_v48 }
  0xcf   :  { %v80_v54 = vpop.f32.mrf.mxu0  ;;  %v128_v59 = vpack.c.bf16 %v121_v53, %v117_v49 }
  0xd0   :  { %v127_v55 = vpack.c.bf16 %v80_v54, %v76_v50  ;;  %v123_v56 = vpop.f32.mrf.mxu1 }
  0xd1   :  { %v129_v58 = vpack.c.bf16 %v123_v56, %v119_v51 }
  0xd2   :  { %418 = vmatprep.mubr.bf16.mxu0 %v127_v55 }
  0xd3   :  { %459 = vmatprep.mubr.bf16.mxu1 %v129_v58  ;;  %419 = vmatmul.mubr.bf16.vlgmr.msra.gmra.mxu0 %v126_v57 }
  0xd4   :  { %460 = vmatmul.mubr.bf16.vlgmr.msra.gmra.mxu1 %v128_v59  ;;  %615 = vmatprep.mubr.msk.bf16.mxu0 %vm656_vm1, %v655_v60 }
 0x193   :  { %v583_v61 = vpop.f32.mrf.mxu0 }
 0x194   :  { %v605_v62 = vpop.f32.mrf.mxu1 }
 0x195   :  { %v584_v63 = vpop.f32.mrf.mxu0 }
 0x196   :  { %v606_v0 = vpop.f32.mrf.mxu1  ;;  %v585_v3 = vadd.f32 %v584_v63, %v583_v61 }
 0x197   :  { %v586_v1 = vpop.f32.mrf.mxu0  ;;  %v607_v4 = vadd.f32 %v606_v0, %v605_v62 }
 0x198   :  { %v608_v2 = vpop.f32.mrf.mxu1 }
 0x199   :  { %v587_v5 = vpop.f32.mrf.mxu0  ;;  %v462_v9 = vadd.f32 %v607_v4, %v585_v3 }
 0x19a   :  { %v588_v6 = vadd.f32 %v587_v5, %v586_v1  ;;  %v609_v7 = vpop.f32.mrf.mxu1 }
 0x19b   :  { %v610_v8 = vadd.f32 %v609_v7, %v608_v2 }
 0x19d   :  { %v465_v10 = vadd.f32 %v610_v8, %v588_v6 }
 0x19f   :  { %v471_v13 = vpack.c.bf16 %v465_v10, %v462_v9 }
 0x1a1   :  { %614 = vmatpush3.bf16.msra.mxu0 %v471_v13 }
 0x1a4   :  { %616 = vmatmul.mubr.msk.bf16.vlgmr.msra.gmra.mxu0 %vm36_vm0, %v470_v14 }
 0x264   :  { %v516_v16 = vpop.f32.mrf.mxu0 }
 0x265   :  { %v517_v17 = vadd.f32 %v565_v15, %v516_v16 }
 0x266   :  { %v617_v18 = vpop.f32.mrf.mxu0 }
 0x267   :  { %v523_v19 = vmax.f32 %v517_v17, 0.0 }
 0x268   :  { %v519_v20 = vpop.f32.mrf.mxu0 }
 0x269   :  { %525 = vst [vmem:[%s836_s5] sm:$0xff] %v523_v19  ;;  %v520_v21 = vadd.f32 %v565_v15, %v519_v20 }
 0x26a   :  { %v618_v22 = vpop.f32.mrf.mxu0 }
 0x26b   :  { %v524_v23 = vmax.f32 %v520_v21, 0.0 }
 0x26d   :  { %526 = vst [vmem:[%s836_s5 + $0x8] sm:$0xff] %v524_v23 }

// kernel: forward.7
= control target key start
LH: loop header
LB: loop body
LE: loop exit
PB: predicated region body
PF: predicated region fallthrough
CT: control target
= control target key end

     0   :  { %v1124_v3 = vmov 0   ;;  %v1125_v4 = vmov 0.0   ;;  %vm1126_vm0 = vmmov 0   ;;  %vm38_vm1 = vcmask 130048   ;;  %s1445_s2 = inlined_call_operand.vmem [shape: f32[16,384], index: 2, kind: input, shape index: {}]   ;;  %s1446_s0 = inlined_call_operand.vmem [shape: f32[16,16], index: 0, kind: input, shape index: {}]   ;;  %s1447_s3 = inlined_call_operand.vmem [shape: bf16[384,128], index: 3, kind: input, shape index: {}]   ;;  %s1448_s6 = inlined_call_operand.vmem [shape: f32[16,512], index: 6, kind: output, shape index: {0}]   ;;  %s1449_s5 = inlined_call_operand.vmem [shape: bf16[512,128], index: 5, kind: input, shape index: {}]   ;;  %s1450_s1 = inlined_call_operand.vmem [shape: f32[16,16], index: 1, kind: input, shape index: {}]   ;;  %s1451_s4 = inlined_call_operand.vmem [shape: f32[1,128], index: 4, kind: input, shape index: {}]   ;;  %s1452_s7 = inlined_call_operand.vmem [shape: f32[16,128], index: 7, kind: output, shape index: {1}]  }
   0x1   :  { %v30_v0 = vld [vmem:[%s1445_s2 + $0x8] sm:$0xff]  ;;  %v33_v1 = vld [vmem:[%s1445_s2 + $0x20] sm:$0xff]  ;;  %74 = vmatprep.mubr.bf16.mxu0 %v1124_v3  ;;  %999 = vmatprep.subr.bf16.mxu1 %v1125_v4  ;;  %v32_v6 = vld [vmem:[%s1445_s2 + $0x18] sm:$0xff] }
   0x2   :  { %v29_v2 = vld [vmem:[%s1445_s2] sm:$0xff]  ;;  %v36_v5 = vpack.c.bf16 %v33_v1, %v30_v0  ;;  %v27_v8 = vld [vmem:[%s1446_s0 + $0x8] sm:$0xff]  ;;  %1015 = vmatprep.mubr.msk.bf16.mxu1 %vm1126_vm0, %v1125_v4  ;;  %v31_v10 = vld [vmem:[%s1445_s2 + $0x10] sm:$0xff] }
   0x3   :  { %v26_v7 = vld [vmem:[%s1446_s0] sm:$0xff]  ;;  %v35_v9 = vpack.c.bf16 %v32_v6, %v29_v2  ;;  %v34_v11 = vld [vmem:[%s1445_s2 + $0x28] sm:$0xff]  ;;  %v1068_v14 = vld [vmem:[%s1447_s3 + $0x78] sm:$0xff]  }
   0x4   :  { %56 = vmatprep.subr.bf16.mxu0 %v36_v5  ;;  %v28_v12 = vpack.c.bf16 %v27_v8, %v26_v7  ;;  %v37_v13 = vpack.c.bf16 %v34_v11, %v31_v10  ;;  %v1072_v15 = vld [vmem:[%s1447_s3 + $0xb8] sm:$0xff]   ;;  %v1075_v16 = vld [vmem:[%s1447_s3 + $0xb0] sm:$0xff]   ;;  %v1078_v19 = vld [vmem:[%s1447_s3 + $0xa8] sm:$0xff]  }
   0x5   :  { %57 = vmatpush1.bf16.msra.mxu0 %v35_v9  ;;  %1000 = vmatpush3.bf16.msra.mxu1 %v1072_v15  ;;  %v1069_v17 = vld [vmem:[%s1447_s3 + $0x38] sm:$0xff]   ;;  %v1070_v18 = vld [vmem:[%s1447_s3 + $0x70] sm:$0xff]   ;;  %v1073_v21 = vld [vmem:[%s1447_s3 + $0x68] sm:$0xff]  }
   0x6   :  { %993 = vmatprep.subr.bf16.mxu0 %v1125_v4  ;;  %1001 = vmatprep.subr.bf16.mxu1 %v1125_v4  ;;  %v1071_v20 = vld [vmem:[%s1447_s3 + $0x30] sm:$0xff]   ;;  %v1081_v22 = vld [vmem:[%s1447_s3 + $0xa0] sm:$0xff]   ;;  %v1074_v23 = vld [vmem:[%s1447_s3 + $0x28] sm:$0xff]  }
   0x7   :  { %v1076_v24 = vld [vmem:[%s1447_s3 + $0x60] sm:$0xff]   ;;  %v1079_v26 = vld [vmem:[%s1447_s3 + $0x58] sm:$0xff]   ;;  %v1082_v28 = vld [vmem:[%s1447_s3 + $0x50] sm:$0xff]  }
   0x8   :  { %858 = vmatmul.mubr.msk.bf16.vlgmr.msra.gmra.mxu0 %vm38_vm1, %v28_v12  ;;  %v1077_v25 = vld [vmem:[%s1447_s3 + $0x20] sm:$0xff]   ;;  %v1080_v27 = vld [vmem:[%s1447_s3 + $0x18] sm:$0xff]   ;;  %v1083_v29 = vld [vmem:[%s1447_s3 + $0x10] sm:$0xff]  }
   0x9   :  { %994 = vmatpush3.bf16.msra.mxu0 %v37_v13  ;;  %995 = vmatprep.mubr.msk.bf16.mxu0 %vm1126_vm0, %v1125_v4  ;;  %v1084_v30 = vld [vmem:[%s1447_s3 + $0x98] sm:$0xff]   ;;  %v1085_v31 = vld [vmem:[%s1447_s3 + $0x48] sm:$0xff]   ;;  %v1087_v33 = vld [vmem:[%s1447_s3 + $0x90] sm:$0xff]  }
   0xa   :  { %920 = vmatprep.subr.bf16.mxu0 %v1068_v14  ;;  %1002 = vmatpush3.bf16.msra.mxu1 %v1075_v16  ;;  %v1086_v32 = vld [vmem:[%s1447_s3 + $0x8] sm:$0xff]   ;;  %v1088_v34 = vld [vmem:[%s1447_s3 + $0x40] sm:$0xff]   ;;  %v1108_v49 = vld [vmem:[%s1449_s5 + $0xf8] sm:$0xff]  }
   0xb   :  { %1003 = vmatprep.subr.bf16.mxu1 %v1125_v4  ;;  %v1089_v35 = vld [vmem:[%s1447_s3] sm:$0xff]   ;;  %v1090_v36 = vld [vmem:[%s1447_s3 + $0x88] sm:$0xff]   ;;  %v1109_v50 = vld [vmem:[%s1449_s5 + $0xf0] sm:$0xff]  }
   0xc   :  { %v1091_v37 = vld [vmem:[%s1447_s3 + $0x80] sm:$0xff]   ;;  %v1110_v51 = vld [vmem:[%s1449_s5 + $0xe8] sm:$0xff]   ;;  %v1112_v53 = vld [vmem:[%s1449_s5 + $0xd8] sm:$0xff]  }
   0xd   :  { %v1111_v52 = vld [vmem:[%s1449_s5 + $0xe0] sm:$0xff]   ;;  %v1113_v54 = vld [vmem:[%s1449_s5 + $0xd0] sm:$0xff]   ;;  %v404_v3 = vld [vmem:[%s1450_s1 + $0x8] sm:$0xff] }
   0xe   :  { %1004 = vmatpush3.bf16.msra.mxu1 %v1078_v19  ;;  %v403_v2 = vld [vmem:[%s1450_s1] sm:$0xff]  ;;  %v1092_v6 = vld [vmem:[%s1449_s5 + $0x78] sm:$0xff]   ;;  %v1094_v10 = vld [vmem:[%s1449_s5 + $0x70] sm:$0xff]  }
   0xf   :  { %1005 = vmatprep.subr.bf16.mxu1 %v1125_v4  ;;  %v405_v8 = vpack.c.bf16 %v404_v3, %v403_v2  ;;  %v1093_v9 = vld [vmem:[%s1449_s5 + $0x38] sm:$0xff]   ;;  %v1095_v11 = vld [vmem:[%s1449_s5 + $0x30] sm:$0xff]   ;;  %v1097_v13 = vld [vmem:[%s1449_s5 + $0x28] sm:$0xff]  }
  0x10   :  { %996 = vmatmul.mubr.msk.bf16.vlgmr.msra.gmra.mxu0 %vm38_vm1, %v28_v12  ;;  %v1096_v12 = vld [vmem:[%s1449_s5 + $0x68] sm:$0xff]   ;;  %v1098_v14 = vld [vmem:[%s1449_s5 + $0x60] sm:$0xff]   ;;  %v1100_v16 = vld [vmem:[%s1449_s5 + $0x58] sm:$0xff]  }
  0x11   :  { %921 = vmatpush3.bf16.msra.mxu0 %v1069_v17  ;;  %v1099_v15 = vld [vmem:[%s1449_s5 + $0x20] sm:$0xff]   ;;  %v1101_v17 = vld [vmem:[%s1449_s5 + $0x18] sm:$0xff]   ;;  %v1103_v19 = vld [vmem:[%s1449_s5 + $0x10] sm:$0xff]  }
  0x12   :  { %922 = vmatprep.subr.bf16.mxu0 %v1070_v18  ;;  %1006 = vmatpush3.bf16.msra.mxu1 %v1081_v22  ;;  %v1102_v18 = vld [vmem:[%s1449_s5 + $0x50] sm:$0xff]   ;;  %v1106_v22 = vld [vmem:[%s1449_s5 + $0x40] sm:$0xff]  }
  0x13   :  { %1007 = vmatprep.subr.bf16.mxu1 %v1125_v4 }
  0x15   :  { %923 = vmatpush3.bf16.msra.mxu0 %v1071_v20  ;;  %v1104_v20 = vld [vmem:[%s1449_s5 + $0x48] sm:$0xff]  }
  0x16   :  { %924 = vmatprep.subr.bf16.mxu0 %v1073_v21  ;;  %1008 = vmatpush3.bf16.msra.mxu1 %v1084_v30  ;;  %v1105_v21 = vld [vmem:[%s1449_s5 + $0x8] sm:$0xff]  }
  0x17   :  { %1009 = vmatprep.subr.bf16.mxu1 %v1125_v4 }
  0x19   :  { %925 = vmatpush3.bf16.msra.mxu0 %v1074_v23  ;;  %v1107_v23 = vld [vmem:[%s1449_s5] sm:$0xff]  }
  0x1a   :  { %926 = vmatprep.subr.bf16.mxu0 %v1076_v24  ;;  %1010 = vmatpush3.bf16.msra.mxu1 %v1087_v33  ;;  %v1114_v24 = vld [vmem:[%s1449_s5 + $0xc8] sm:$0xff]  }
  0x1b   :  { %1011 = vmatprep.subr.bf16.mxu1 %v1125_v4 }
  0x1d   :  { %927 = vmatpush3.bf16.msra.mxu0 %v1077_v25  ;;  %v1115_v25 = vld [vmem:[%s1449_s5 + $0xc0] sm:$0xff]  }
  0x1e   :  { %928 = vmatprep.subr.bf16.mxu0 %v1079_v26  ;;  %1012 = vmatpush3.bf16.msra.mxu1 %v1090_v36  ;;  %v884_v26 = vld [vmem:[%s1451_s4] ss:$0 sm:$0xff] }
  0x1f   :  { %1013 = vmatprep.subr.bf16.mxu1 %v1125_v4 }
  0x21   :  { %929 = vmatpush3.bf16.msra.mxu0 %v1080_v27 }
  0x22   :  { %930 = vmatprep.subr.bf16.mxu0 %v1082_v28  ;;  %1014 = vmatpush3.bf16.msra.mxu1 %v1091_v37  ;;  %v1117_v37 = vld [vmem:[%s1449_s5 + $0xb0] sm:$0xff]  }
  0x23   :  { %1025 = vmatprep.subr.bf16.mxu1 %v1125_v4 }
  0x25   :  { %931 = vmatpush3.bf16.msra.mxu0 %v1083_v29 }
  0x26   :  { %932 = vmatprep.subr.bf16.mxu0 %v1085_v31 }
  0x29   :  { %933 = vmatpush3.bf16.msra.mxu0 %v1086_v32 }
  0x2a   :  { %934 = vmatprep.subr.bf16.mxu0 %v1088_v34 }
  0x2d   :  { %935 = vmatpush3.bf16.msra.mxu0 %v1089_v35  ;;  %v1116_v35 = vld [vmem:[%s1449_s5 + $0xb8] sm:$0xff]  }
  0x2e   :  { %1019 = vmatprep.subr.bf16.mxu0 %v1125_v4 }
  0xc8   :  { %v76_v38 = vpop.f32.mrf.mxu0 }
  0xc9   :  { %460 = vst [vmem:[%s1448_s6] sm:$0xff] %v76_v38 }
  0xca   :  { %v78_v39 = vpop.f32.mrf.mxu0 }
  0xcb   :  { %461 = vst [vmem:[%s1448_s6 + $0x8] sm:$0xff] %v78_v39 }
  0xcc   :  { %v80_v40 = vpop.f32.mrf.mxu0 }
  0xcd   :  { %463 = vst [vmem:[%s1448_s6 + $0x20] sm:$0xff] %v80_v40  ;;  %v1292_v43 = vpack.c.bf16 %v80_v40, %v76_v38  ;;  %v1118_v38 = vld [vmem:[%s1449_s5 + $0xa8] sm:$0xff]   ;;  %v1120_v40 = vld [vmem:[%s1449_s5 + $0x98] sm:$0xff]  }
  0xce   :  { %v82_v41 = vpop.f32.mrf.mxu0 }
  0xcf   :  { %v127_v42 = vpack.c.bf16 %v82_v41, %v78_v39  ;;  %464 = vst [vmem:[%s1448_s6 + $0x28] sm:$0xff] %v82_v41  ;;  %v1119_v39 = vld [vmem:[%s1449_s5 + $0xa0] sm:$0xff]   ;;  %v1121_v41 = vld [vmem:[%s1449_s5 + $0x90] sm:$0xff]  }
  0xd0   :  { %v119_v44 = vpop.f32.mrf.mxu0 }
  0xd1   :  { %462 = vst [vmem:[%s1448_s6 + $0x10] sm:$0xff] %v119_v44  ;;  %353 = vmatprep.mubr.bf16.mxu0 %v127_v42 }
  0xd2   :  { %v997_v45 = vpop.f32.mrf.mxu0  ;;  %354 = vmatmul.mubr.bf16.vlgmr.msra.gmra.mxu0 %v1292_v43 }
  0xd3   :  { %1021 = vmatprep.mubr.msk.bf16.mxu0 %vm1126_vm0, %v1125_v4 }
  0xd4   :  { %v122_v46 = vpop.f32.mrf.mxu0 }
  0xd5   :  { %v1300_v47 = vpack.c.bf16 %v122_v46, %v119_v44  ;;  %465 = vst [vmem:[%s1448_s6 + $0x30] sm:$0xff] %v122_v46 }
  0xd6   :  { %v998_v48 = vpop.f32.mrf.mxu0 }
  0xd7   :  { %1016 = vmatmul.mubr.bf16.vlgmr.msra.gmra.mxu1 %v1300_v47 }
  0xd8   :  { %1041 = vmatprep.mubr.msk.bf16.mxu1 %vm1126_vm0, %v1125_v4  ;;  %1026 = vmatpush3.bf16.msra.mxu1 %v1108_v49 }
  0xd9   :  { %1027 = vmatprep.subr.bf16.mxu1 %v1125_v4 }
  0xdc   :  { %1028 = vmatpush3.bf16.msra.mxu1 %v1109_v50 }
  0xdd   :  { %1029 = vmatprep.subr.bf16.mxu1 %v1125_v4 }
  0xe0   :  { %1030 = vmatpush3.bf16.msra.mxu1 %v1110_v51 }
  0xe1   :  { %1031 = vmatprep.subr.bf16.mxu1 %v1125_v4 }
  0xe4   :  { %1032 = vmatpush3.bf16.msra.mxu1 %v1111_v52 }
  0xe5   :  { %1033 = vmatprep.subr.bf16.mxu1 %v1125_v4 }
  0xe8   :  { %1034 = vmatpush3.bf16.msra.mxu1 %v1112_v53 }
  0xe9   :  { %1035 = vmatprep.subr.bf16.mxu1 %v1125_v4 }
  0xec   :  { %1036 = vmatpush3.bf16.msra.mxu1 %v1113_v54 }
  0xed   :  { %1037 = vmatprep.subr.bf16.mxu1 %v1125_v4 }
  0xf0   :  { %1038 = vmatpush3.bf16.msra.mxu1 %v1114_v24 }
  0xf1   :  { %1039 = vmatprep.subr.bf16.mxu1 %v1125_v4 }
  0xf4   :  { %1040 = vmatpush3.bf16.msra.mxu1 %v1115_v25 }
  0xf5   :  { %1045 = vmatprep.subr.bf16.mxu1 %v1125_v4 }
 0x192   :  { %v936_v55 = vpop.f32.mrf.mxu0 }
 0x194   :  { %v937_v56 = vpop.f32.mrf.mxu0 }
 0x195   :  { %v938_v59 = vadd.f32 %v937_v56, %v936_v55 }
 0x196   :  { %v939_v57 = vpop.f32.mrf.mxu0 }
 0x197   :  { %v396_v58 = vpop.f32.mrf.mxu1 }
 0x198   :  { %v940_v60 = vpop.f32.mrf.mxu0  ;;  %v397_v0 = vadd.f32 %v938_v59, %v396_v58 }
 0x199   :  { %v941_v61 = vadd.f32 %v940_v60, %v939_v57  ;;  %v1017_v62 = vpop.f32.mrf.mxu1 }
 0x19b   :  { %v399_v63 = vpop.f32.mrf.mxu1 }
 0x19c   :  { %v400_v1 = vadd.f32 %v941_v61, %v399_v63 }
 0x19d   :  { %v1018_v5 = vpop.f32.mrf.mxu1 }
 0x19e   :  { %v406_v7 = vpack.c.bf16 %v400_v1, %v397_v0 }
 0x1a0   :  { %1020 = vmatpush3.bf16.msra.mxu0 %v406_v7 }
 0x1a1   :  { %962 = vmatprep.subr.bf16.mxu0 %v1092_v6 }
 0x1a3   :  { %1022 = vmatmul.mubr.msk.bf16.vlgmr.msra.gmra.mxu0 %vm38_vm1, %v405_v8 }
 0x1a4   :  { %963 = vmatpush3.bf16.msra.mxu0 %v1093_v9  ;;  %798 = vmatprep.mubr.bf16.mxu0 %v127_v42  ;;  %v1122_v42 = vld [vmem:[%s1449_s5 + $0x88] sm:$0xff]  }
 0x1a5   :  { %964 = vmatprep.subr.bf16.mxu0 %v1094_v10 }
 0x1a8   :  { %965 = vmatpush3.bf16.msra.mxu0 %v1095_v11 }
 0x1a9   :  { %966 = vmatprep.subr.bf16.mxu0 %v1096_v12 }
 0x1ac   :  { %967 = vmatpush3.bf16.msra.mxu0 %v1097_v13 }
 0x1ad   :  { %968 = vmatprep.subr.bf16.mxu0 %v1098_v14 }
 0x1b0   :  { %969 = vmatpush3.bf16.msra.mxu0 %v1099_v15 }
 0x1b1   :  { %970 = vmatprep.subr.bf16.mxu0 %v1100_v16 }
 0x1b4   :  { %971 = vmatpush3.bf16.msra.mxu0 %v1101_v17 }
 0x1b5   :  { %972 = vmatprep.subr.bf16.mxu0 %v1102_v18 }
 0x1b8   :  { %973 = vmatpush3.bf16.msra.mxu0 %v1103_v19 }
 0x1b9   :  { %974 = vmatprep.subr.bf16.mxu0 %v1104_v20 }
 0x1bc   :  { %975 = vmatpush3.bf16.msra.mxu0 %v1105_v21 }
 0x1bd   :  { %976 = vmatprep.subr.bf16.mxu0 %v1106_v22 }
 0x1c0   :  { %977 = vmatpush3.bf16.msra.mxu0 %v1107_v23 }
 0x1c3   :  { %799 = vmatmul.mubr.bf16.vlgmr.msra.gmra.mxu0 %v1292_v43  ;;  %v1123_v43 = vld [vmem:[%s1449_s5 + $0x80] sm:$0xff]  }
 0x263   :  { %v451_v27 = vpop.f32.mrf.mxu0 }
 0x264   :  { %v452_v28 = vadd.f32 %v884_v26, %v451_v27 }
 0x265   :  { %v1023_v29 = vpop.f32.mrf.mxu0 }
 0x266   :  { %v458_v30 = vmax.f32 %v452_v28, 0.0 }
 0x267   :  { %v454_v31 = vpop.f32.mrf.mxu0 }
 0x268   :  { %466 = vst [vmem:[%s1448_s6 + $0x18] sm:$0xff] %v458_v30  ;;  %v455_v32 = vadd.f32 %v884_v26, %v454_v31 }
 0x269   :  { %v1024_v33 = vpop.f32.mrf.mxu0 }
 0x26a   :  { %v459_v34 = vmax.f32 %v455_v32, 0.0 }
 0x26c   :  { %467 = vst [vmem:[%s1448_s6 + $0x38] sm:$0xff] %v459_v34  ;;  %v516_v36 = vpack.c.bf16 %v459_v34, %v458_v30 }
 0x26e   :  { %1042 = vmatmul.mubr.bf16.vlgmr.msra.gmra.mxu1 %v516_v36 }
 0x26f   :  { %1046 = vmatpush3.bf16.msra.mxu1 %v1116_v35  ;;  %1061 = vmatprep.mubr.msk.bf16.mxu1 %vm1126_vm0, %v1125_v4 }
 0x270   :  { %1047 = vmatprep.subr.bf16.mxu1 %v1125_v4 }
 0x273   :  { %1048 = vmatpush3.bf16.msra.mxu1 %v1117_v37 }
 0x274   :  { %1049 = vmatprep.subr.bf16.mxu1 %v1125_v4 }
 0x277   :  { %1050 = vmatpush3.bf16.msra.mxu1 %v1118_v38 }
 0x278   :  { %1051 = vmatprep.subr.bf16.mxu1 %v1125_v4 }
 0x27b   :  { %1052 = vmatpush3.bf16.msra.mxu1 %v1119_v39 }
 0x27c   :  { %1053 = vmatprep.subr.bf16.mxu1 %v1125_v4 }
 0x27f   :  { %1054 = vmatpush3.bf16.msra.mxu1 %v1120_v40 }
 0x280   :  { %1055 = vmatprep.subr.bf16.mxu1 %v1125_v4 }
 0x283   :  { %1056 = vmatpush3.bf16.msra.mxu1 %v1121_v41  ;;  %v978_v49 = vpop.f32.mrf.mxu0 }
 0x284   :  { %1057 = vmatprep.subr.bf16.mxu1 %v1125_v4 }
 0x285   :  { %v979_v50 = vpop.f32.mrf.mxu0 }
 0x286   :  { %v980_v52 = vadd.f32 %v979_v50, %v978_v49 }
 0x287   :  { %1058 = vmatpush3.bf16.msra.mxu1 %v1122_v42  ;;  %v981_v51 = vpop.f32.mrf.mxu0 }
 0x288   :  { %1059 = vmatprep.subr.bf16.mxu1 %v1125_v4 }
 0x289   :  { %v982_v53 = vpop.f32.mrf.mxu0 }
 0x28a   :  { %v983_v56 = vadd.f32 %v982_v53, %v981_v51 }
 0x28b   :  { %1060 = vmatpush3.bf16.msra.mxu1 %v1123_v43 }
 0x28e   :  { %1062 = vmatmul.mubr.bf16.vlgmr.msra.gmra.mxu1 %v1300_v47 }
 0x32e   :  { %v615_v44 = vpop.f32.mrf.mxu1 }
 0x32f   :  { %v801_v54 = vadd.f32 %v980_v52, %v615_v44 }
 0x330   :  { %v1043_v45 = vpop.f32.mrf.mxu1 }
 0x332   :  { %v618_v46 = vpop.f32.mrf.mxu1 }
 0x333   :  { %v804_v59 = vadd.f32 %v983_v56, %v618_v46 }
 0x334   :  { %v1044_v48 = vpop.f32.mrf.mxu1 }
 0x34e   :  { %v841_v55 = vpop.f32.mrf.mxu1 }
 0x34f   :  { %v842_v57 = vadd.f32 %v841_v55, %v801_v54 }
 0x350   :  { %v1063_v58 = vpop.f32.mrf.mxu1 }
 0x351   :  { %848 = vst [vmem:[%s1452_s7] sm:$0xff] %v842_v57 }
 0x352   :  { %v844_v4 = vpop.f32.mrf.mxu1 }
 0x353   :  { %v845_v47 = vadd.f32 %v844_v4, %v804_v59 }
 0x354   :  { %v1064_v60 = vpop.f32.mrf.mxu1 }
 0x355   :  { %849 = vst [vmem:[%s1452_s7 + $0x8] sm:$0xff] %v845_v47 }

// kernel: forward.9
= control target key start
LH: loop header
LB: loop body
LE: loop exit
PB: predicated region body
PF: predicated region fallthrough
CT: control target
= control target key end

     0   :  { %v1039_v0 = vmov 0.0   ;;  %vm1040_vm0 = vmmov 0   ;;  %vm260_vm1 = vcmask 130048   ;;  %s1336_s3 = inlined_call_operand.vmem [shape: bf16[256,128], index: 3, kind: input, shape index: {}]   ;;  %s1337_s2 = inlined_call_operand.vmem [shape: f32[16,128], index: 2, kind: input, shape index: {}]   ;;  %s1338_s1 = inlined_call_operand.vmem [shape: f32[16,128], index: 1, kind: input, shape index: {}]   ;;  %s1339_s5 = inlined_call_operand.vmem [shape: bf16[256,128], index: 5, kind: input, shape index: {}]   ;;  %s1340_s0 = inlined_call_operand.vmem [shape: f32[16,16], index: 0, kind: input, shape index: {}]   ;;  %s1341_s7 = inlined_call_operand.vmem [shape: bf16[256,128], index: 7, kind: input, shape index: {}]   ;;  %s1342_s4 = inlined_call_operand.vmem [shape: f32[1,128], index: 4, kind: input, shape index: {}]   ;;  %s1343_s6 = inlined_call_operand.vmem [shape: f32[1,128], index: 6, kind: input, shape index: {}]   ;;  %s1344_s8 = inlined_call_operand.vmem [shape: f32[1,128], index: 8, kind: input, shape index: {}]   ;;  %s1345_s9 = inlined_call_operand.vmem [shape: f32[16,128], index: 9, kind: output, shape index: {}]  }
   0x1   :  { %863 = vmatprep.subr.bf16.mxu0 %v1039_v0  ;;  %883 = vmatprep.subr.bf16.mxu1 %v1039_v0  ;;  %v991_v1 = vld [vmem:[%s1336_s3 + $0x78] sm:$0xff]   ;;  %v993_v3 = vld [vmem:[%s1336_s3 + $0x70] sm:$0xff]   ;;  %v995_v5 = vld [vmem:[%s1336_s3 + $0x68] sm:$0xff]  }
   0x2   :  { %v992_v2 = vld [vmem:[%s1336_s3 + $0x38] sm:$0xff]   ;;  %879 = vmatprep.mubr.msk.bf16.mxu0 %vm1040_vm0, %v1039_v0  ;;  %899 = vmatprep.mubr.msk.bf16.mxu1 %vm1040_vm0, %v1039_v0  ;;  %v994_v4 = vld [vmem:[%s1336_s3 + $0x30] sm:$0xff]   ;;  %v996_v6 = vld [vmem:[%s1336_s3 + $0x28] sm:$0xff]  }
   0x3   :  { %864 = vmatpush3.bf16.msra.mxu0 %v991_v1  ;;  %884 = vmatpush3.bf16.msra.mxu1 %v992_v2  ;;  %v997_v7 = vld [vmem:[%s1336_s3 + $0x60] sm:$0xff]   ;;  %v999_v9 = vld [vmem:[%s1336_s3 + $0x58] sm:$0xff]   ;;  %v1001_v11 = vld [vmem:[%s1336_s3 + $0x50] sm:$0xff]  }
   0x4   :  { %865 = vmatprep.subr.bf16.mxu0 %v1039_v0  ;;  %885 = vmatprep.subr.bf16.mxu1 %v1039_v0  ;;  %v998_v8 = vld [vmem:[%s1336_s3 + $0x20] sm:$0xff]   ;;  %v1000_v10 = vld [vmem:[%s1336_s3 + $0x18] sm:$0xff]   ;;  %v1002_v12 = vld [vmem:[%s1336_s3 + $0x10] sm:$0xff]  }
   0x5   :  { %v1003_v13 = vld [vmem:[%s1336_s3 + $0x48] sm:$0xff]   ;;  %v1005_v15 = vld [vmem:[%s1336_s3 + $0x40] sm:$0xff]   ;;  %v1008_v23 = vld [vmem:[%s1339_s5 + $0x78] sm:$0xff]  }
   0x6   :  { %v1004_v14 = vld [vmem:[%s1336_s3 + $0x8] sm:$0xff]   ;;  %v52_v16 = vld [vmem:[%s1337_s2] sm:$0xff]  ;;  %v1010_v24 = vld [vmem:[%s1339_s5 + $0x70] sm:$0xff]  }
   0x7   :  { %866 = vmatpush3.bf16.msra.mxu0 %v993_v3  ;;  %886 = vmatpush3.bf16.msra.mxu1 %v994_v4  ;;  %v53_v17 = vld [vmem:[%s1337_s2 + $0x8] sm:$0xff]  ;;  %v1006_v18 = vld [vmem:[%s1336_s3] sm:$0xff]   ;;  %v1016_v27 = vld [vmem:[%s1339_s5 + $0x58] sm:$0xff]  }
   0x8   :  { %867 = vmatprep.subr.bf16.mxu0 %v1039_v0  ;;  %887 = vmatprep.subr.bf16.mxu1 %v1039_v0  ;;  %v33_v19 = vld [vmem:[%s1338_s1] sm:$0xff]  ;;  %v34_v20 = vld [vmem:[%s1338_s1 + $0x8] sm:$0xff]  ;;  %v54_v21 = vpack.c.bf16 %v53_v17, %v52_v16  ;;  %v1007_v42 = vld [vmem:[%s1339_s5 + $0x38] sm:$0xff]  }
   0x9   :  { %v1171_v22 = vpack.c.bf16 %v34_v20, %v33_v19  ;;  %v1012_v25 = vld [vmem:[%s1339_s5 + $0x68] sm:$0xff]   ;;  %v1014_v26 = vld [vmem:[%s1339_s5 + $0x60] sm:$0xff]   ;;  %v1009_v43 = vld [vmem:[%s1339_s5 + $0x30] sm:$0xff]  }
   0xa   :  { %v249_v37 = vld [vmem:[%s1340_s0] sm:$0xff]  ;;  %v250_v38 = vld [vmem:[%s1340_s0 + $0x8] sm:$0xff]  ;;  %v1015_v46 = vld [vmem:[%s1339_s5 + $0x18] sm:$0xff]  }
   0xb   :  { %868 = vmatpush3.bf16.msra.mxu0 %v995_v5  ;;  %888 = vmatpush3.bf16.msra.mxu1 %v996_v6  ;;  %v251_v41 = vpack.c.bf16 %v250_v38, %v249_v37  ;;  %v1011_v44 = vld [vmem:[%s1339_s5 + $0x28] sm:$0xff]   ;;  %v1013_v45 = vld [vmem:[%s1339_s5 + $0x20] sm:$0xff]   ;;  %v1017_v47 = vld [vmem:[%s1339_s5 + $0x10] sm:$0xff]  }
   0xc   :  { %869 = vmatprep.subr.bf16.mxu0 %v1039_v0  ;;  %889 = vmatprep.subr.bf16.mxu1 %v1039_v0  ;;  %v1019_v48 = vld [vmem:[%s1339_s5 + $0x8] sm:$0xff]   ;;  %v1018_v49 = vld [vmem:[%s1339_s5 + $0x50] sm:$0xff]   ;;  %v1021_v50 = vld [vmem:[%s1339_s5] sm:$0xff]  }
   0xd   :  { %v1020_v51 = vld [vmem:[%s1339_s5 + $0x48] sm:$0xff]   ;;  %v1022_v52 = vld [vmem:[%s1339_s5 + $0x40] sm:$0xff]   ;;  %v1023_v53 = vld [vmem:[%s1341_s7 + $0x38] sm:$0xff]  }
   0xe   :  { %v1025_v54 = vld [vmem:[%s1341_s7 + $0x30] sm:$0xff]   ;;  %v1027_v55 = vld [vmem:[%s1341_s7 + $0x28] sm:$0xff]   ;;  %v1029_v56 = vld [vmem:[%s1341_s7 + $0x20] sm:$0xff]  }
   0xf   :  { %870 = vmatpush3.bf16.msra.mxu0 %v997_v7  ;;  %890 = vmatpush3.bf16.msra.mxu1 %v998_v8  ;;  %v1031_v57 = vld [vmem:[%s1341_s7 + $0x18] sm:$0xff]   ;;  %v771_v58 = vld [vmem:[%s1342_s4] ss:$0 sm:$0xff]  ;;  %v1026_v6 = vld [vmem:[%s1341_s7 + $0x70] sm:$0xff]  }
  0x10   :  { %871 = vmatprep.subr.bf16.mxu0 %v1039_v0  ;;  %891 = vmatprep.subr.bf16.mxu1 %v1039_v0  ;;  %v1024_v4 = vld [vmem:[%s1341_s7 + $0x78] sm:$0xff]   ;;  %v1028_v7 = vld [vmem:[%s1341_s7 + $0x68] sm:$0xff]   ;;  %v1030_v8 = vld [vmem:[%s1341_s7 + $0x60] sm:$0xff]  }
  0x11   :  { %v1037_v17 = vld [vmem:[%s1341_s7] sm:$0xff]  }
  0x12   :  { %v1038_v19 = vld [vmem:[%s1341_s7 + $0x40] sm:$0xff]  }
  0x13   :  { %872 = vmatpush3.bf16.msra.mxu0 %v999_v9  ;;  %892 = vmatpush3.bf16.msra.mxu1 %v1000_v10  ;;  %v1032_v9 = vld [vmem:[%s1341_s7 + $0x58] sm:$0xff]  }
  0x14   :  { %873 = vmatprep.subr.bf16.mxu0 %v1039_v0  ;;  %893 = vmatprep.subr.bf16.mxu1 %v1039_v0 }
  0x17   :  { %874 = vmatpush3.bf16.msra.mxu0 %v1001_v11  ;;  %894 = vmatpush3.bf16.msra.mxu1 %v1002_v12  ;;  %v1033_v11 = vld [vmem:[%s1341_s7 + $0x10] sm:$0xff]  }
  0x18   :  { %875 = vmatprep.subr.bf16.mxu0 %v1039_v0  ;;  %895 = vmatprep.subr.bf16.mxu1 %v1039_v0 }
  0x1b   :  { %876 = vmatpush3.bf16.msra.mxu0 %v1003_v13  ;;  %896 = vmatpush3.bf16.msra.mxu1 %v1004_v14  ;;  %v1035_v14 = vld [vmem:[%s1341_s7 + $0x8] sm:$0xff]  }
  0x1c   :  { %877 = vmatprep.subr.bf16.mxu0 %v1039_v0  ;;  %897 = vmatprep.subr.bf16.mxu1 %v1039_v0 }
  0x1f   :  { %878 = vmatpush3.bf16.msra.mxu0 %v1005_v15  ;;  %898 = vmatpush3.bf16.msra.mxu1 %v1006_v18  ;;  %v1034_v15 = vld [vmem:[%s1341_s7 + $0x50] sm:$0xff]   ;;  %v1036_v18 = vld [vmem:[%s1341_s7 + $0x48] sm:$0xff]  }
  0x20   :  { %903 = vmatprep.subr.bf16.mxu0 %v1039_v0  ;;  %909 = vmatprep.subr.bf16.mxu1 %v1039_v0 }
  0x22   :  { %880 = vmatmul.mubr.bf16.vlgmr.msra.gmra.mxu0 %v54_v21  ;;  %900 = vmatmul.mubr.bf16.vlgmr.msra.gmra.mxu1 %v1171_v22 }
  0x23   :  { %905 = vmatprep.mubr.msk.bf16.mxu0 %vm1040_vm0, %v1039_v0  ;;  %925 = vmatprep.mubr.msk.bf16.mxu1 %vm1040_vm0, %v1039_v0 }
  0x24   :  { %910 = vmatpush3.bf16.msra.mxu1 %v1008_v23  ;;  %v789_v23 = vld [vmem:[%s1343_s6] ss:$0 sm:$0xff] }
  0x25   :  { %911 = vmatprep.subr.bf16.mxu1 %v1039_v0 }
  0x28   :  { %912 = vmatpush3.bf16.msra.mxu1 %v1010_v24 }
  0x29   :  { %913 = vmatprep.subr.bf16.mxu1 %v1039_v0 }
  0x2c   :  { %914 = vmatpush3.bf16.msra.mxu1 %v1012_v25 }
  0x2d   :  { %915 = vmatprep.subr.bf16.mxu1 %v1039_v0 }
  0x30   :  { %916 = vmatpush3.bf16.msra.mxu1 %v1014_v26 }
  0x31   :  { %917 = vmatprep.subr.bf16.mxu1 %v1039_v0 }
  0x34   :  { %918 = vmatpush3.bf16.msra.mxu1 %v1016_v27 }
  0x35   :  { %919 = vmatprep.subr.bf16.mxu1 %v1039_v0 }
  0x38   :  { %920 = vmatpush3.bf16.msra.mxu1 %v1018_v49 }
  0x39   :  { %921 = vmatprep.subr.bf16.mxu1 %v1039_v0 }
  0x3c   :  { %922 = vmatpush3.bf16.msra.mxu1 %v1020_v51 }
  0x3d   :  { %923 = vmatprep.subr.bf16.mxu1 %v1039_v0 }
  0x40   :  { %924 = vmatpush3.bf16.msra.mxu1 %v1022_v52 }
  0x41   :  { %949 = vmatprep.subr.bf16.mxu1 %v1039_v0 }
  0xe2   :  { %v153_v28 = vpop.f32.mrf.mxu0  ;;  %v242_v29 = vpop.f32.mrf.mxu1 }
  0xe3   :  { %v243_v34 = vadd.f32 %v242_v29, %v153_v28 }
  0xe4   :  { %v881_v30 = vpop.f32.mrf.mxu0  ;;  %v901_v31 = vpop.f32.mrf.mxu1 }
  0xe6   :  { %v156_v32 = vpop.f32.mrf.mxu0  ;;  %v245_v33 = vpop.f32.mrf.mxu1 }
  0xe7   :  { %v246_v35 = vadd.f32 %v245_v33, %v156_v32 }
  0xe8   :  { %v882_v36 = vpop.f32.mrf.mxu0  ;;  %v902_v39 = vpop.f32.mrf.mxu1 }
  0xe9   :  { %v252_v40 = vpack.c.bf16 %v246_v35, %v243_v34  ;;  %v806_v36 = vld [vmem:[%s1344_s8] ss:$0 sm:$0xff] }
  0xeb   :  { %904 = vmatpush3.bf16.msra.mxu0 %v252_v40 }
  0xec   :  { %929 = vmatprep.subr.bf16.mxu0 %v1039_v0 }
  0xee   :  { %906 = vmatmul.mubr.msk.bf16.vlgmr.msra.gmra.mxu0 %vm260_vm1, %v251_v41 }
  0xef   :  { %930 = vmatpush3.bf16.msra.mxu0 %v1007_v42  ;;  %945 = vmatprep.mubr.msk.bf16.mxu0 %vm1040_vm0, %v1039_v0 }
  0xf0   :  { %931 = vmatprep.subr.bf16.mxu0 %v1039_v0 }
  0xf3   :  { %932 = vmatpush3.bf16.msra.mxu0 %v1009_v43 }
  0xf4   :  { %933 = vmatprep.subr.bf16.mxu0 %v1039_v0 }
  0xf7   :  { %934 = vmatpush3.bf16.msra.mxu0 %v1011_v44 }
  0xf8   :  { %935 = vmatprep.subr.bf16.mxu0 %v1039_v0 }
  0xfb   :  { %936 = vmatpush3.bf16.msra.mxu0 %v1013_v45 }
  0xfc   :  { %937 = vmatprep.subr.bf16.mxu0 %v1039_v0 }
  0xff   :  { %938 = vmatpush3.bf16.msra.mxu0 %v1015_v46 }
 0x100   :  { %939 = vmatprep.subr.bf16.mxu0 %v1039_v0 }
 0x103   :  { %940 = vmatpush3.bf16.msra.mxu0 %v1017_v47 }
 0x104   :  { %941 = vmatprep.subr.bf16.mxu0 %v1039_v0 }
 0x107   :  { %942 = vmatpush3.bf16.msra.mxu0 %v1019_v48 }
 0x108   :  { %943 = vmatprep.subr.bf16.mxu0 %v1039_v0 }
 0x10b   :  { %944 = vmatpush3.bf16.msra.mxu0 %v1021_v50 }
 0x10c   :  { %969 = vmatprep.subr.bf16.mxu0 %v1039_v0 }
 0x10e   :  { %946 = vmatmul.mubr.bf16.vlgmr.msra.gmra.mxu0 %v1171_v22 }
 0x10f   :  { %985 = vmatprep.mubr.msk.bf16.mxu0 %vm1040_vm0, %v1039_v0  ;;  %970 = vmatpush3.bf16.msra.mxu0 %v1023_v53 }
 0x110   :  { %971 = vmatprep.subr.bf16.mxu0 %v1039_v0 }
 0x113   :  { %972 = vmatpush3.bf16.msra.mxu0 %v1025_v54 }
 0x114   :  { %973 = vmatprep.subr.bf16.mxu0 %v1039_v0 }
 0x117   :  { %974 = vmatpush3.bf16.msra.mxu0 %v1027_v55 }
 0x118   :  { %975 = vmatprep.subr.bf16.mxu0 %v1039_v0 }
 0x11b   :  { %976 = vmatpush3.bf16.msra.mxu0 %v1029_v56 }
 0x11c   :  { %977 = vmatprep.subr.bf16.mxu0 %v1039_v0 }
 0x11f   :  { %978 = vmatpush3.bf16.msra.mxu0 %v1031_v57 }
 0x120   :  { %979 = vmatprep.subr.bf16.mxu0 %v1039_v0 }
 0x123   :  { %980 = vmatpush3.bf16.msra.mxu0 %v1033_v11 }
 0x124   :  { %981 = vmatprep.subr.bf16.mxu0 %v1039_v0 }
 0x127   :  { %982 = vmatpush3.bf16.msra.mxu0 %v1035_v14 }
 0x128   :  { %983 = vmatprep.subr.bf16.mxu0 %v1039_v0 }
 0x12b   :  { %984 = vmatpush3.bf16.msra.mxu0 %v1037_v17 }
 0x12e   :  { %986 = vmatmul.mubr.bf16.vlgmr.msra.gmra.mxu0 %v1171_v22 }
 0x1ae   :  { %v298_v59 = vpop.f32.mrf.mxu0 }
 0x1af   :  { %v299_v61 = vadd.f32 %v771_v58, %v298_v59 }
 0x1b0   :  { %v907_v60 = vpop.f32.mrf.mxu0 }
 0x1b1   :  { %v305_v2 = vmax.f32 %v299_v61, 0.0 }
 0x1b2   :  { %v301_v62 = vpop.f32.mrf.mxu0 }
 0x1b3   :  { %v302_v63 = vadd.f32 %v771_v58, %v301_v62 }
 0x1b4   :  { %v908_v1 = vpop.f32.mrf.mxu0 }
 0x1b5   :  { %v306_v3 = vmax.f32 %v302_v63, 0.0 }
 0x1b7   :  { %v323_v5 = vpack.c.bf16 %v306_v3, %v305_v2 }
 0x1b9   :  { %926 = vmatmul.mubr.bf16.vlgmr.msra.gmra.mxu1 %v323_v5 }
 0x1ba   :  { %950 = vmatpush3.bf16.msra.mxu1 %v1024_v4  ;;  %965 = vmatprep.mubr.msk.bf16.mxu1 %vm1040_vm0, %v1039_v0 }
 0x1bb   :  { %951 = vmatprep.subr.bf16.mxu1 %v1039_v0 }
 0x1be   :  { %952 = vmatpush3.bf16.msra.mxu1 %v1026_v6 }
 0x1bf   :  { %953 = vmatprep.subr.bf16.mxu1 %v1039_v0 }
 0x1c2   :  { %954 = vmatpush3.bf16.msra.mxu1 %v1028_v7 }
 0x1c3   :  { %955 = vmatprep.subr.bf16.mxu1 %v1039_v0 }
 0x1c6   :  { %956 = vmatpush3.bf16.msra.mxu1 %v1030_v8 }
 0x1c7   :  { %957 = vmatprep.subr.bf16.mxu1 %v1039_v0 }
 0x1ca   :  { %958 = vmatpush3.bf16.msra.mxu1 %v1032_v9 }
 0x1cb   :  { %959 = vmatprep.subr.bf16.mxu1 %v1039_v0 }
 0x1ce   :  { %v511_v10 = vpop.f32.mrf.mxu0  ;;  %960 = vmatpush3.bf16.msra.mxu1 %v1034_v15 }
 0x1cf   :  { %961 = vmatprep.subr.bf16.mxu1 %v1039_v0 }
 0x1d0   :  { %v947_v12 = vpop.f32.mrf.mxu0 }
 0x1d2   :  { %v514_v13 = vpop.f32.mrf.mxu0  ;;  %962 = vmatpush3.bf16.msra.mxu1 %v1036_v18 }
 0x1d3   :  { %963 = vmatprep.subr.bf16.mxu1 %v1039_v0 }
 0x1d4   :  { %v948_v16 = vpop.f32.mrf.mxu0 }
 0x1d6   :  { %964 = vmatpush3.bf16.msra.mxu1 %v1038_v19 }
 0x1ee   :  { %v733_v31 = vpop.f32.mrf.mxu0 }
 0x1f0   :  { %v987_v32 = vpop.f32.mrf.mxu0 }
 0x1f2   :  { %v736_v33 = vpop.f32.mrf.mxu0 }
 0x1f4   :  { %v988_v34 = vpop.f32.mrf.mxu0 }
 0x279   :  { %v422_v20 = vpop.f32.mrf.mxu1 }
 0x27a   :  { %v512_v21 = vadd.f32 %v511_v10, %v422_v20 }
 0x27b   :  { %v927_v24 = vpop.f32.mrf.mxu1 }
 0x27c   :  { %v525_v26 = vadd.f32 %v789_v23, %v512_v21 }
 0x27d   :  { %v425_v25 = vpop.f32.mrf.mxu1 }
 0x27e   :  { %v515_v27 = vadd.f32 %v514_v13, %v425_v25  ;;  %v527_v0 = vmax.f32 %v525_v26, 0.0 }
 0x27f   :  { %v928_v28 = vpop.f32.mrf.mxu1 }
 0x280   :  { %v526_v29 = vadd.f32 %v789_v23, %v515_v27 }
 0x282   :  { %v528_v30 = vmax.f32 %v526_v29, 0.0 }
 0x284   :  { %v545_v22 = vpack.c.bf16 %v528_v30, %v527_v0 }
 0x286   :  { %966 = vmatmul.mubr.bf16.vlgmr.msra.gmra.mxu1 %v545_v22 }
 0x346   :  { %v644_v35 = vpop.f32.mrf.mxu1 }
 0x347   :  { %v734_v37 = vadd.f32 %v733_v31, %v644_v35 }
 0x348   :  { %v967_v38 = vpop.f32.mrf.mxu1 }
 0x349   :  { %v747_v39 = vadd.f32 %v806_v36, %v734_v37 }
 0x34a   :  { %v647_v40 = vpop.f32.mrf.mxu1 }
 0x34b   :  { %749 = vst [vmem:[%s1345_s9] sm:$0xff] %v747_v39  ;;  %v737_v41 = vadd.f32 %v736_v33, %v647_v40 }
 0x34c   :  { %v968_v42 = vpop.f32.mrf.mxu1 }
 0x34d   :  { %v748_v43 = vadd.f32 %v806_v36, %v737_v41 }
 0x34f   :  { %750 = vst [vmem:[%s1345_s9 + $0x8] sm:$0xff] %v748_v43 }

</bundles_post_ra>
